<compile_context>
chip_gen: v7x
topology: tpu7x:2x2x1
jax: 0.10.0
libtpu: 0.0.40
codegen_flags: <defaults>
</compile_context>

<pallas_src>
import functools
import math

import jax
import jax.numpy as jnp
from jax import lax
from jax.experimental import pallas as pl
from jax.experimental.pallas import tpu as pltpu


_SQRT_2_OVER_PI = 0.7978845608028654
_LN_EPS = 1e-5


def _gelu_tanh(v):
    return 0.5 * v * (1.0 + jnp.tanh(_SQRT_2_OVER_PI * (v + 0.044715 * v * v * v)))


def _layernorm(v, g, b):
    m = jnp.mean(v, axis=-1, keepdims=True)
    c = v - m
    var = jnp.mean(c * c, axis=-1, keepdims=True)
    return c * lax.rsqrt(var + _LN_EPS) * g + b


def _mm(a_f32, w_bf16):
    # bf16 operands + f32 accumulation: native MXU rate on v5e/v6e/v7x.
    return jnp.dot(a_f32.astype(jnp.bfloat16), w_bf16,
                   preferred_element_type=jnp.float32)


def _sdpa(q_f32, k_f32, v_f32, wo, bo, attn_ref, *, num_heads, head_dim):
    """Scaled dot-product attention; per-head outputs go to attn_ref (VMEM f32 scratch)."""
    scale = 1.0 / math.sqrt(head_dim)
    # Cast once; fold the scale into q (single (S,HD) multiply).
    q = (q_f32 * scale).astype(jnp.bfloat16)
    k = k_f32.astype(jnp.bfloat16)
    v = v_f32.astype(jnp.bfloat16)
    # TODO(synk): lax.fori_loop + flash tiling once num_heads / S grow.
    for h in range(num_heads):
        lo = h * head_dim
        hi = lo + head_dim
        s = lax.dot_general(q[:, lo:hi], k[:, lo:hi], (((1,), (1,)), ((), ())),
                            preferred_element_type=jnp.float32)          # (S, T)
        s = s - jnp.max(s, axis=-1, keepdims=True)
        p = jnp.exp(s)
        p = p * pl.reciprocal(jnp.sum(p, axis=-1, keepdims=True), approx=True)
        attn_ref[:, lo:hi] = jnp.dot(p.astype(jnp.bfloat16), v[:, lo:hi],
                                     preferred_element_type=jnp.float32)  # (S, Hd)
    return _mm(attn_ref[...], wo) + bo


def _transformer_block_kernel(
        x_ref, y_ref,
        g1_ref, b1_ref, wqkv1_ref, wo1_ref, bo1_ref,
        g2_ref, b2_ref, wq2_ref, wkv2_ref, wo2_ref, bo2_ref,
        g3_ref, b3_ref, wg_ref, bg_ref, wf_ref, bf_ref,
        o_ref, attn_ref, *, num_heads, head_dim, ff_dim):
    hd_total = num_heads * head_dim
    x = x_ref[0].astype(jnp.float32)      # (S, D)   residual stream in f32
    y = y_ref[0].astype(jnp.float32)      # (T, Dkv) encoder states

    # --- 1) self-attention (fused QKV projection) ---
    xn = _layernorm(x, g1_ref[...], b1_ref[...])
    qkv = _mm(xn, wqkv1_ref[...])                                    # (S, 3*HD)
    x = x + _sdpa(qkv[:, :hd_total], qkv[:, hd_total:2 * hd_total], qkv[:, 2 * hd_total:],
                  wo1_ref[...], bo1_ref[...], attn_ref,
                  num_heads=num_heads, head_dim=head_dim)

    # --- 2) cross-attention (fused KV projection) ---
    xn = _layernorm(x, g2_ref[...], b2_ref[...])
    q = _mm(xn, wq2_ref[...])                                        # (S, HD)
    kv = _mm(y, wkv2_ref[...])                                       # (T, 2*HD)
    x = x + _sdpa(q, kv[:, :hd_total], kv[:, hd_total:],
                  wo2_ref[...], bo2_ref[...], attn_ref,
                  num_heads=num_heads, head_dim=head_dim)

    # --- 3) GEGLU + output projection ---
    xn = _layernorm(x, g3_ref[...], b3_ref[...])
    proj = _mm(xn, wg_ref[...]) + bg_ref[...]                        # (S, 2*ff_dim)
    hidden = proj[:, :ff_dim]
    gate = proj[:, ff_dim:]
    x = x + (_mm(hidden * _gelu_tanh(gate), wf_ref[...]) + bf_ref[...])

    o_ref[...] = x[None, :, :].astype(o_ref.dtype)


def basic_transformer_block_forward(hidden_states, encoder_hidden_states, params,
                                    *, num_heads, head_dim):
    """Pallas equivalent of BasicTransformerBlock.forward.

    hidden_states:         (N, S, D)
    encoder_hidden_states: (N, T, Dkv)
    params: torch-convention parameters (nn.Linear weights are (out, in)).
    """
    N, S, D = hidden_states.shape
    _, T, Dkv = encoder_hidden_states.shape
    HD = num_heads * head_dim
    Dff = 4 * D
    out_dtype = hidden_states.dtype

    def wT(name):      # torch (out, in) -> (in, out), bf16 for the MXU
        return jnp.transpose(params[name]).astype(jnp.bfloat16)

    def vec(name):     # 1-D params as f32 (1, X) rows (added post-accumulation)
        p = params[name]
        return p.astype(jnp.float32).reshape(1, p.shape[0])

    # Fused projection weights (wrapper-side concat; DMA'd into VMEM once).
    wqkv1 = jnp.concatenate([wT("attn1_wq"), wT("attn1_wk"), wT("attn1_wv")], axis=1)  # (D, 3HD)
    wkv2 = jnp.concatenate([wT("attn2_wk"), wT("attn2_wv")], axis=1)                   # (Dkv, 2HD)

    args = (
        hidden_states, encoder_hidden_states,
        vec("norm1_w"), vec("norm1_b"), wqkv1, wT("attn1_wo"), vec("attn1_bo"),
        vec("norm2_w"), vec("norm2_b"), wT("attn2_wq"), wkv2, wT("attn2_wo"), vec("attn2_bo"),
        vec("norm3_w"), vec("norm3_b"), wT("geglu_w"), vec("geglu_b"), wT("ff_w"), vec("ff_b"),
    )

    def full_block(a):
        nd = a.ndim
        return pl.BlockSpec(tuple(a.shape), lambda n, _nd=nd: (0,) * _nd)  # fetched once

    in_specs = [
        pl.BlockSpec((1, S, D), lambda n: (n, 0, 0)),
        pl.BlockSpec((1, T, Dkv), lambda n: (n, 0, 0)),
    ] + [full_block(a) for a in args[2:]]
    out_specs = pl.BlockSpec((1, S, D), lambda n: (n, 0, 0))

    # ---- VMEM budget (explicit limit, computed from actual block + intermediate sizes) ----
    itemsize = jnp.dtype(out_dtype).itemsize
    weight_bytes = sum(int(a.nbytes) for a in args[2:])
    act_block_bytes = (S * D + T * Dkv + S * D) * itemsize
    f32_inter_bytes = 4 * (S * (3 * HD + 2 * Dff + 8 * D + HD) + S * max(S, T) + S * HD)
    vmem_limit = int(min(64 * 1024 * 1024,
                         max(16 * 1024 * 1024,
                             4 * (2 * weight_bytes + 2 * act_block_bytes + f32_inter_bytes))))

    # ---- Cost estimate (includes activation reads) ----
    flops = 2 * N * (
        S * D * (3 * HD) + 2 * num_heads * S * S * head_dim + S * HD * D       # attn1
        + S * D * HD + T * Dkv * (2 * HD)
        + 2 * num_heads * S * T * head_dim + S * HD * D                        # attn2
        + S * D * (2 * Dff) + S * Dff * D                                      # GEGLU + ff
    )
    transcendentals = N * (num_heads * S * (S + T) + S * Dff)
    bytes_accessed = int(weight_bytes
                         + N * (S * D + T * Dkv + S * D) * itemsize)

    kernel = functools.partial(_transformer_block_kernel,
                               num_heads=num_heads, head_dim=head_dim, ff_dim=Dff)

    return pl.pallas_call(
        kernel,
        out_shape=jax.ShapeDtypeStruct((N, S, D), out_dtype),
        grid_spec=pltpu.PrefetchScalarGridSpec(
            num_scalar_prefetch=0,
            grid=(N,),
            in_specs=in_specs,
            out_specs=out_specs,
            scratch_shapes=[pltpu.VMEM((S, HD), jnp.float32)],   # per-head attn accumulator
        ),
        compiler_params=pltpu.CompilerParams(
            dimension_semantics=("parallel",),
            vmem_limit_bytes=vmem_limit,
        ),
        cost_estimate=pl.CostEstimate(flops=int(flops),
                                      transcendentals=int(transcendentals),
                                      bytes_accessed=int(bytes_accessed)),
    )(*args)


# ----------------------------- pure-JAX reference -----------------------------
def _reference(hidden_states, encoder_hidden_states, params, *, num_heads, head_dim):
    x = hidden_states.astype(jnp.float32)
    y = encoder_hidden_states.astype(jnp.float32)
    p = {k: v.astype(jnp.float32) for k, v in params.items()}

    def layernorm(v, g, b):
        m = v.mean(-1, keepdims=True)
        var = ((v - m) ** 2).mean(-1, keepdims=True)
        return (v - m) / jnp.sqrt(var + _LN_EPS) * g + b

    def linear(v, w, b=None):
        out = v @ w.T
        return out if b is None else out + b

    def attention(q_in, kv_in, wq, wk, wv, wo, bo):
        n, s, _ = q_in.shape
        t = kv_in.shape[1]
        q = linear(q_in, wq).reshape(n, s, num_heads, head_dim)
        k = linear(kv_in, wk).reshape(n, t, num_heads, head_dim)
        v = linear(kv_in, wv).reshape(n, t, num_heads, head_dim)
        sc = jnp.einsum("nqhd,nkhd->nhqk", q, k) / math.sqrt(head_dim)
        a = jax.nn.softmax(sc, axis=-1)
        o = jnp.einsum("nhqk,nkhd->nqhd", a, v).reshape(n, s, num_heads * head_dim)
        return linear(o, wo, bo)

    xn = layernorm(x, p["norm1_w"], p["norm1_b"])
    x = x + attention(xn, xn, p["attn1_wq"], p["attn1_wk"], p["attn1_wv"],
                      p["attn1_wo"], p["attn1_bo"])
    xn = layernorm(x, p["norm2_w"], p["norm2_b"])
    x = x + attention(xn, y, p["attn2_wq"], p["attn2_wk"], p["attn2_wv"],
                      p["attn2_wo"], p["attn2_bo"])
    xn = layernorm(x, p["norm3_w"], p["norm3_b"])
    proj = linear(xn, p["geglu_w"], p["geglu_b"])
    h, gate = jnp.split(proj, 2, axis=-1)
    x = x + linear(h * _gelu_tanh(gate), p["ff_w"], p["ff_b"])
    return x


if __name__ == "__main__":
    N, S, D = 2, 16, 32           # batch, sequence, model dim
    T, Dkv = 8, 64                # encoder sequence, cross-attention dim
    num_heads, head_dim = 2, 16
    HD = num_heads * head_dim
    Dff = 4 * D
    dtype = jnp.bfloat16          # fp16 is also supported; casting happens in-kernel

    keys = iter(jax.random.split(jax.random.PRNGKey(0), 32))

    def rnd(shape, scale=0.1):
        return (scale * jax.random.normal(next(keys), shape)).astype(dtype)

    hidden_states = jax.random.normal(next(keys), (N, S, D), dtype=dtype)
    encoder_hidden_states = jax.random.normal(next(keys), (N, T, Dkv), dtype=dtype)

    params = {
        "norm1_w": (1.0 + 0.1 * jax.random.normal(next(keys), (D,))).astype(dtype),
        "norm1_b": rnd((D,)),
        "attn1_wq": rnd((HD, D)), "attn1_wk": rnd((HD, D)), "attn1_wv": rnd((HD, D)),
        "attn1_wo": rnd((D, HD)), "attn1_bo": rnd((D,), 0.05),
        "norm2_w": (1.0 + 0.1 * jax.random.normal(next(keys), (D,))).astype(dtype),
        "norm2_b": rnd((D,)),
        "attn2_wq": rnd((HD, D)), "attn2_wk": rnd((HD, Dkv)), "attn2_wv": rnd((HD, Dkv)),
        "attn2_wo": rnd((D, HD)), "attn2_bo": rnd((D,), 0.05),
        "norm3_w": (1.0 + 0.1 * jax.random.normal(next(keys), (D,))).astype(dtype),
        "norm3_b": rnd((D,)),
        "geglu_w": rnd((2 * Dff, D)), "geglu_b": rnd((2 * Dff,), 0.05),
        "ff_w": rnd((D, Dff)), "ff_b": rnd((D,), 0.05),
    }

    out = basic_transformer_block_forward(
        hidden_states, encoder_hidden_states, params,
        num_heads=num_heads, head_dim=head_dim)
    out = jax.block_until_ready(out)

    ref = _reference(hidden_states, encoder_hidden_states, params,
                     num_heads=num_heads, head_dim=head_dim)

    ok = (out.shape == ref.shape) and (out.dtype == dtype)
    ok = ok and bool(jnp.allclose(out.astype(jnp.float32), ref, atol=5e-2, rtol=5e-2))

    print("KERNEL_OK" if ok else "KERNEL_MISMATCH")
</pallas_src>

<mosaic_0001>
module attributes {stable_mosaic.version = 11 : i64} {
  func.func @_transformer_block_kernel(%arg0: i32, %arg1: memref<1x16x32xbf16, #tpu.memory_space<vmem>>, %arg2: memref<1x8x64xbf16, #tpu.memory_space<vmem>>, %arg3: memref<1x32xf32, #tpu.memory_space<vmem>>, %arg4: memref<1x32xf32, #tpu.memory_space<vmem>>, %arg5: memref<32x96xbf16, #tpu.memory_space<vmem>>, %arg6: memref<32x32xbf16, #tpu.memory_space<vmem>>, %arg7: memref<1x32xf32, #tpu.memory_space<vmem>>, %arg8: memref<1x32xf32, #tpu.memory_space<vmem>>, %arg9: memref<1x32xf32, #tpu.memory_space<vmem>>, %arg10: memref<32x32xbf16, #tpu.memory_space<vmem>>, %arg11: memref<64x64xbf16, #tpu.memory_space<vmem>>, %arg12: memref<32x32xbf16, #tpu.memory_space<vmem>>, %arg13: memref<1x32xf32, #tpu.memory_space<vmem>>, %arg14: memref<1x32xf32, #tpu.memory_space<vmem>>, %arg15: memref<1x32xf32, #tpu.memory_space<vmem>>, %arg16: memref<32x256xbf16, #tpu.memory_space<vmem>>, %arg17: memref<1x256xf32, #tpu.memory_space<vmem>>, %arg18: memref<128x32xbf16, #tpu.memory_space<vmem>>, %arg19: memref<1x32xf32, #tpu.memory_space<vmem>>, %arg20: memref<1x16x32xbf16, #tpu.memory_space<vmem>>, %arg21: memref<16x32xf32, #tpu.memory_space<vmem>>) attributes {dimension_semantics = [#tpu.dimension_semantics<parallel>], iteration_bounds = array<i64: 2>, scalar_prefetch = 0 : i64, scratch_operands = 1 : i64, tpu.core_type = #tpu.core_type<tc>, window_params = [{transform_indices = @transform_0, window_bounds = array<i64: 1, 16, 32>}, {transform_indices = @transform_1, window_bounds = array<i64: 1, 8, 64>}, {pipeline_mode = #tpu.pipeline_mode<synchronous>, transform_indices = @transform_2, window_bounds = array<i64: 1, 32>}, {pipeline_mode = #tpu.pipeline_mode<synchronous>, transform_indices = @transform_3, window_bounds = array<i64: 1, 32>}, {pipeline_mode = #tpu.pipeline_mode<synchronous>, transform_indices = @transform_4, window_bounds = array<i64: 32, 96>}, {pipeline_mode = #tpu.pipeline_mode<synchronous>, transform_indices = @transform_5, window_bounds = array<i64: 32, 32>}, {pipeline_mode = #tpu.pipeline_mode<synchronous>, transform_indices = @transform_6, window_bounds = array<i64: 1, 32>}, {pipeline_mode = #tpu.pipeline_mode<synchronous>, transform_indices = @transform_7, window_bounds = array<i64: 1, 32>}, {pipeline_mode = #tpu.pipeline_mode<synchronous>, transform_indices = @transform_8, window_bounds = array<i64: 1, 32>}, {pipeline_mode = #tpu.pipeline_mode<synchronous>, transform_indices = @transform_9, window_bounds = array<i64: 32, 32>}, {pipeline_mode = #tpu.pipeline_mode<synchronous>, transform_indices = @transform_10, window_bounds = array<i64: 64, 64>}, {pipeline_mode = #tpu.pipeline_mode<synchronous>, transform_indices = @transform_11, window_bounds = array<i64: 32, 32>}, {pipeline_mode = #tpu.pipeline_mode<synchronous>, transform_indices = @transform_12, window_bounds = array<i64: 1, 32>}, {pipeline_mode = #tpu.pipeline_mode<synchronous>, transform_indices = @transform_13, window_bounds = array<i64: 1, 32>}, {pipeline_mode = #tpu.pipeline_mode<synchronous>, transform_indices = @transform_14, window_bounds = array<i64: 1, 32>}, {pipeline_mode = #tpu.pipeline_mode<synchronous>, transform_indices = @transform_15, window_bounds = array<i64: 32, 256>}, {pipeline_mode = #tpu.pipeline_mode<synchronous>, transform_indices = @transform_16, window_bounds = array<i64: 1, 256>}, {pipeline_mode = #tpu.pipeline_mode<synchronous>, transform_indices = @transform_17, window_bounds = array<i64: 128, 32>}, {pipeline_mode = #tpu.pipeline_mode<synchronous>, transform_indices = @transform_18, window_bounds = array<i64: 1, 32>}, {transform_indices = @transform_19, window_bounds = array<i64: 1, 16, 32>}]} {
    %c0 = arith.constant 0 : index
    %c0_0 = arith.constant 0 : index
    %c0_1 = arith.constant 0 : index
    %0 = vector.load %arg1[%c0, %c0_0, %c0_1] : memref<1x16x32xbf16, #tpu.memory_space<vmem>>, vector<1x16x32xbf16>
    %1 = vector.shape_cast %0 : vector<1x16x32xbf16> to vector<16x32xbf16>
    %2 = arith.extf %1 : vector<16x32xbf16> to vector<16x32xf32>
    %c0_2 = arith.constant 0 : index
    %c0_3 = arith.constant 0 : index
    %c0_4 = arith.constant 0 : index
    %3 = vector.load %arg2[%c0_2, %c0_3, %c0_4] : memref<1x8x64xbf16, #tpu.memory_space<vmem>>, vector<1x8x64xbf16>
    %4 = vector.shape_cast %3 : vector<1x8x64xbf16> to vector<8x64xbf16>
    %5 = arith.extf %4 : vector<8x64xbf16> to vector<8x64xf32>
    %c0_5 = arith.constant 0 : index
    %c0_6 = arith.constant 0 : index
    %6 = vector.load %arg3[%c0_5, %c0_6] : memref<1x32xf32, #tpu.memory_space<vmem>>, vector<1x32xf32>
    %c0_7 = arith.constant 0 : index
    %c0_8 = arith.constant 0 : index
    %7 = vector.load %arg4[%c0_7, %c0_8] : memref<1x32xf32, #tpu.memory_space<vmem>>, vector<1x32xf32>
    %cst = arith.constant dense<0.000000e+00> : vector<16xf32>
    %8 = vector.multi_reduction <add>, %2, %cst [1] : vector<16x32xf32> to vector<16xf32>
    %9 = vector.shape_cast %8 : vector<16xf32> to vector<16x1xf32>
    %cst_9 = arith.constant 3.200000e+01 : f32
    %10 = vector.broadcast %cst_9 : f32 to vector<16x1xf32>
    %11 = arith.divf %9, %10 : vector<16x1xf32>
    %12 = vector.broadcast %11 : vector<16x1xf32> to vector<16x32xf32>
    %13 = arith.subf %2, %12 : vector<16x32xf32>
    %14 = arith.mulf %13, %13 : vector<16x32xf32>
    %cst_10 = arith.constant dense<0.000000e+00> : vector<16xf32>
    %15 = vector.multi_reduction <add>, %14, %cst_10 [1] : vector<16x32xf32> to vector<16xf32>
    %16 = vector.shape_cast %15 : vector<16xf32> to vector<16x1xf32>
    %cst_11 = arith.constant 3.200000e+01 : f32
    %17 = vector.broadcast %cst_11 : f32 to vector<16x1xf32>
    %18 = arith.divf %16, %17 : vector<16x1xf32>
    %cst_12 = arith.constant 9.99999974E-6 : f32
    %19 = vector.broadcast %cst_12 : f32 to vector<16x1xf32>
    %20 = arith.addf %18, %19 : vector<16x1xf32>
    %21 = math.rsqrt %20 : vector<16x1xf32>
    %22 = vector.broadcast %21 : vector<16x1xf32> to vector<16x32xf32>
    %23 = arith.mulf %13, %22 : vector<16x32xf32>
    %24 = vector.broadcast %6 : vector<1x32xf32> to vector<16x32xf32>
    %25 = arith.mulf %23, %24 : vector<16x32xf32>
    %26 = vector.broadcast %7 : vector<1x32xf32> to vector<16x32xf32>
    %27 = arith.addf %25, %26 : vector<16x32xf32>
    %c0_13 = arith.constant 0 : index
    %c0_14 = arith.constant 0 : index
    %28 = vector.load %arg5[%c0_13, %c0_14] : memref<32x96xbf16, #tpu.memory_space<vmem>>, vector<32x96xbf16>
    %29 = arith.truncf %27 : vector<16x32xf32> to vector<16x32xbf16>
    %cst_15 = arith.constant dense<0.000000e+00> : vector<16x96xf32>
    %30 = tpu.matmul %29, %28, %cst_15 {dimension_numbers = #tpu.dot_dimension_numbers<[1], [0], [0], [1], [0, 0, 1, 1], [], []>} : vector<16x32xbf16>, vector<32x96xbf16>, vector<16x96xf32> -> vector<16x96xf32>
    %31 = vector.extract_strided_slice %30 {offsets = [0, 0], sizes = [16, 32], strides = [1, 1]} : vector<16x96xf32> to vector<16x32xf32>
    %32 = vector.extract_strided_slice %30 {offsets = [0, 32], sizes = [16, 32], strides = [1, 1]} : vector<16x96xf32> to vector<16x32xf32>
    %33 = vector.extract_strided_slice %30 {offsets = [0, 64], sizes = [16, 32], strides = [1, 1]} : vector<16x96xf32> to vector<16x32xf32>
    %c0_16 = arith.constant 0 : index
    %c0_17 = arith.constant 0 : index
    %34 = vector.load %arg6[%c0_16, %c0_17] : memref<32x32xbf16, #tpu.memory_space<vmem>>, vector<32x32xbf16>
    %c0_18 = arith.constant 0 : index
    %c0_19 = arith.constant 0 : index
    %35 = vector.load %arg7[%c0_18, %c0_19] : memref<1x32xf32, #tpu.memory_space<vmem>>, vector<1x32xf32>
    %cst_20 = arith.constant 2.500000e-01 : f32
    %36 = vector.broadcast %cst_20 : f32 to vector<16x32xf32>
    %37 = arith.mulf %31, %36 : vector<16x32xf32>
    %38 = arith.truncf %37 : vector<16x32xf32> to vector<16x32xbf16>
    %39 = arith.truncf %32 : vector<16x32xf32> to vector<16x32xbf16>
    %40 = arith.truncf %33 : vector<16x32xf32> to vector<16x32xbf16>
    %41 = vector.extract_strided_slice %38 {offsets = [0, 0], sizes = [16, 16], strides = [1, 1]} : vector<16x32xbf16> to vector<16x16xbf16>
    %42 = vector.extract_strided_slice %39 {offsets = [0, 0], sizes = [16, 16], strides = [1, 1]} : vector<16x32xbf16> to vector<16x16xbf16>
    %cst_21 = arith.constant dense<0.000000e+00> : vector<16x16xf32>
    %43 = tpu.matmul %41, %42, %cst_21 {dimension_numbers = #tpu.dot_dimension_numbers<[1], [1], [0], [0], [0, 0, 1, 0], [], []>} : vector<16x16xbf16>, vector<16x16xbf16>, vector<16x16xf32> -> vector<16x16xf32>
    %cst_22 = arith.constant dense<0xFF800000> : vector<16xf32>
    %44 = vector.multi_reduction <maximumf>, %43, %cst_22 [1] : vector<16x16xf32> to vector<16xf32>
    %45 = vector.shape_cast %44 : vector<16xf32> to vector<16x1xf32>
    %46 = vector.broadcast %45 : vector<16x1xf32> to vector<16x16xf32>
    %47 = arith.subf %43, %46 : vector<16x16xf32>
    %48 = math.exp %47 : vector<16x16xf32>
    %cst_23 = arith.constant dense<0.000000e+00> : vector<16xf32>
    %49 = vector.multi_reduction <add>, %48, %cst_23 [1] : vector<16x16xf32> to vector<16xf32>
    %50 = vector.shape_cast %49 : vector<16xf32> to vector<16x1xf32>
    %51 = tpu.reciprocal %50 {approx = true} : vector<16x1xf32> -> vector<16x1xf32>
    %52 = vector.broadcast %51 : vector<16x1xf32> to vector<16x16xf32>
    %53 = arith.mulf %48, %52 : vector<16x16xf32>
    %54 = arith.truncf %53 : vector<16x16xf32> to vector<16x16xbf16>
    %55 = vector.extract_strided_slice %40 {offsets = [0, 0], sizes = [16, 16], strides = [1, 1]} : vector<16x32xbf16> to vector<16x16xbf16>
    %cst_24 = arith.constant dense<0.000000e+00> : vector<16x16xf32>
    %56 = tpu.matmul %54, %55, %cst_24 {dimension_numbers = #tpu.dot_dimension_numbers<[1], [0], [0], [1], [0, 0, 1, 1], [], []>} : vector<16x16xbf16>, vector<16x16xbf16>, vector<16x16xf32> -> vector<16x16xf32>
    %c0_25 = arith.constant 0 : index
    %c0_26 = arith.constant 0 : index
    %57 = vector.load %arg21[%c0_25, %c0_26] : memref<16x32xf32, #tpu.memory_space<vmem>>, vector<16x16xf32>
    tpu.vector_store %arg21[%c0_25, %c0_26], %56 {strides = array<i32>} : memref<16x32xf32, #tpu.memory_space<vmem>>, vector<16x16xf32>,
    %58 = vector.extract_strided_slice %38 {offsets = [0, 16], sizes = [16, 16], strides = [1, 1]} : vector<16x32xbf16> to vector<16x16xbf16>
    %59 = vector.extract_strided_slice %39 {offsets = [0, 16], sizes = [16, 16], strides = [1, 1]} : vector<16x32xbf16> to vector<16x16xbf16>
    %cst_27 = arith.constant dense<0.000000e+00> : vector<16x16xf32>
    %60 = tpu.matmul %58, %59, %cst_27 {dimension_numbers = #tpu.dot_dimension_numbers<[1], [1], [0], [0], [0, 0, 1, 0], [], []>} : vector<16x16xbf16>, vector<16x16xbf16>, vector<16x16xf32> -> vector<16x16xf32>
    %cst_28 = arith.constant dense<0xFF800000> : vector<16xf32>
    %61 = vector.multi_reduction <maximumf>, %60, %cst_28 [1] : vector<16x16xf32> to vector<16xf32>
    %62 = vector.shape_cast %61 : vector<16xf32> to vector<16x1xf32>
    %63 = vector.broadcast %62 : vector<16x1xf32> to vector<16x16xf32>
    %64 = arith.subf %60, %63 : vector<16x16xf32>
    %65 = math.exp %64 : vector<16x16xf32>
    %cst_29 = arith.constant dense<0.000000e+00> : vector<16xf32>
    %66 = vector.multi_reduction <add>, %65, %cst_29 [1] : vector<16x16xf32> to vector<16xf32>
    %67 = vector.shape_cast %66 : vector<16xf32> to vector<16x1xf32>
    %68 = tpu.reciprocal %67 {approx = true} : vector<16x1xf32> -> vector<16x1xf32>
    %69 = vector.broadcast %68 : vector<16x1xf32> to vector<16x16xf32>
    %70 = arith.mulf %65, %69 : vector<16x16xf32>
    %71 = arith.truncf %70 : vector<16x16xf32> to vector<16x16xbf16>
    %72 = vector.extract_strided_slice %40 {offsets = [0, 16], sizes = [16, 16], strides = [1, 1]} : vector<16x32xbf16> to vector<16x16xbf16>
    %cst_30 = arith.constant dense<0.000000e+00> : vector<16x16xf32>
    %73 = tpu.matmul %71, %72, %cst_30 {dimension_numbers = #tpu.dot_dimension_numbers<[1], [0], [0], [1], [0, 0, 1, 1], [], []>} : vector<16x16xbf16>, vector<16x16xbf16>, vector<16x16xf32> -> vector<16x16xf32>
    %c0_31 = arith.constant 0 : index
    %c16 = arith.constant 16 : index
    %74 = vector.load %arg21[%c0_31, %c16] : memref<16x32xf32, #tpu.memory_space<vmem>>, vector<16x16xf32>
    tpu.vector_store %arg21[%c0_31, %c16], %73 {strides = array<i32>} : memref<16x32xf32, #tpu.memory_space<vmem>>, vector<16x16xf32>,
    %c0_32 = arith.constant 0 : index
    %c0_33 = arith.constant 0 : index
    %75 = vector.load %arg21[%c0_32, %c0_33] : memref<16x32xf32, #tpu.memory_space<vmem>>, vector<16x32xf32>
    %76 = arith.truncf %75 : vector<16x32xf32> to vector<16x32xbf16>
    %cst_34 = arith.constant dense<0.000000e+00> : vector<16x32xf32>
    %77 = tpu.matmul %76, %34, %cst_34 {dimension_numbers = #tpu.dot_dimension_numbers<[1], [0], [0], [1], [0, 0, 1, 1], [], []>} : vector<16x32xbf16>, vector<32x32xbf16>, vector<16x32xf32> -> vector<16x32xf32>
    %78 = vector.broadcast %35 : vector<1x32xf32> to vector<16x32xf32>
    %79 = arith.addf %77, %78 : vector<16x32xf32>
    %80 = arith.addf %2, %79 : vector<16x32xf32>
    %c0_35 = arith.constant 0 : index
    %c0_36 = arith.constant 0 : index
    %81 = vector.load %arg8[%c0_35, %c0_36] : memref<1x32xf32, #tpu.memory_space<vmem>>, vector<1x32xf32>
    %c0_37 = arith.constant 0 : index
    %c0_38 = arith.constant 0 : index
    %82 = vector.load %arg9[%c0_37, %c0_38] : memref<1x32xf32, #tpu.memory_space<vmem>>, vector<1x32xf32>
    %cst_39 = arith.constant dense<0.000000e+00> : vector<16xf32>
    %83 = vector.multi_reduction <add>, %80, %cst_39 [1] : vector<16x32xf32> to vector<16xf32>
    %84 = vector.shape_cast %83 : vector<16xf32> to vector<16x1xf32>
    %cst_40 = arith.constant 3.200000e+01 : f32
    %85 = vector.broadcast %cst_40 : f32 to vector<16x1xf32>
    %86 = arith.divf %84, %85 : vector<16x1xf32>
    %87 = vector.broadcast %86 : vector<16x1xf32> to vector<16x32xf32>
    %88 = arith.subf %80, %87 : vector<16x32xf32>
    %89 = arith.mulf %88, %88 : vector<16x32xf32>
    %cst_41 = arith.constant dense<0.000000e+00> : vector<16xf32>
    %90 = vector.multi_reduction <add>, %89, %cst_41 [1] : vector<16x32xf32> to vector<16xf32>
    %91 = vector.shape_cast %90 : vector<16xf32> to vector<16x1xf32>
    %cst_42 = arith.constant 3.200000e+01 : f32
    %92 = vector.broadcast %cst_42 : f32 to vector<16x1xf32>
    %93 = arith.divf %91, %92 : vector<16x1xf32>
    %cst_43 = arith.constant 9.99999974E-6 : f32
    %94 = vector.broadcast %cst_43 : f32 to vector<16x1xf32>
    %95 = arith.addf %93, %94 : vector<16x1xf32>
    %96 = math.rsqrt %95 : vector<16x1xf32>
    %97 = vector.broadcast %96 : vector<16x1xf32> to vector<16x32xf32>
    %98 = arith.mulf %88, %97 : vector<16x32xf32>
    %99 = vector.broadcast %81 : vector<1x32xf32> to vector<16x32xf32>
    %100 = arith.mulf %98, %99 : vector<16x32xf32>
    %101 = vector.broadcast %82 : vector<1x32xf32> to vector<16x32xf32>
    %102 = arith.addf %100, %101 : vector<16x32xf32>
    %c0_44 = arith.constant 0 : index
    %c0_45 = arith.constant 0 : index
    %103 = vector.load %arg10[%c0_44, %c0_45] : memref<32x32xbf16, #tpu.memory_space<vmem>>, vector<32x32xbf16>
    %104 = arith.truncf %102 : vector<16x32xf32> to vector<16x32xbf16>
    %cst_46 = arith.constant dense<0.000000e+00> : vector<16x32xf32>
    %105 = tpu.matmul %104, %103, %cst_46 {dimension_numbers = #tpu.dot_dimension_numbers<[1], [0], [0], [1], [0, 0, 1, 1], [], []>} : vector<16x32xbf16>, vector<32x32xbf16>, vector<16x32xf32> -> vector<16x32xf32>
    %c0_47 = arith.constant 0 : index
    %c0_48 = arith.constant 0 : index
    %106 = vector.load %arg11[%c0_47, %c0_48] : memref<64x64xbf16, #tpu.memory_space<vmem>>, vector<64x64xbf16>
    %107 = arith.truncf %5 : vector<8x64xf32> to vector<8x64xbf16>
    %cst_49 = arith.constant dense<0.000000e+00> : vector<8x64xf32>
    %108 = tpu.matmul %107, %106, %cst_49 {dimension_numbers = #tpu.dot_dimension_numbers<[1], [0], [0], [1], [0, 0, 1, 1], [], []>} : vector<8x64xbf16>, vector<64x64xbf16>, vector<8x64xf32> -> vector<8x64xf32>
    %109 = vector.extract_strided_slice %108 {offsets = [0, 0], sizes = [8, 32], strides = [1, 1]} : vector<8x64xf32> to vector<8x32xf32>
    %110 = vector.extract_strided_slice %108 {offsets = [0, 32], sizes = [8, 32], strides = [1, 1]} : vector<8x64xf32> to vector<8x32xf32>
    %c0_50 = arith.constant 0 : index
    %c0_51 = arith.constant 0 : index
    %111 = vector.load %arg12[%c0_50, %c0_51] : memref<32x32xbf16, #tpu.memory_space<vmem>>, vector<32x32xbf16>
    %c0_52 = arith.constant 0 : index
    %c0_53 = arith.constant 0 : index
    %112 = vector.load %arg13[%c0_52, %c0_53] : memref<1x32xf32, #tpu.memory_space<vmem>>, vector<1x32xf32>
    %cst_54 = arith.constant 2.500000e-01 : f32
    %113 = vector.broadcast %cst_54 : f32 to vector<16x32xf32>
    %114 = arith.mulf %105, %113 : vector<16x32xf32>
    %115 = arith.truncf %114 : vector<16x32xf32> to vector<16x32xbf16>
    %116 = arith.truncf %109 : vector<8x32xf32> to vector<8x32xbf16>
    %117 = arith.truncf %110 : vector<8x32xf32> to vector<8x32xbf16>
    %118 = vector.extract_strided_slice %115 {offsets = [0, 0], sizes = [16, 16], strides = [1, 1]} : vector<16x32xbf16> to vector<16x16xbf16>
    %119 = vector.extract_strided_slice %116 {offsets = [0, 0], sizes = [8, 16], strides = [1, 1]} : vector<8x32xbf16> to vector<8x16xbf16>
    %cst_55 = arith.constant dense<0.000000e+00> : vector<16x8xf32>
    %120 = tpu.matmul %118, %119, %cst_55 {dimension_numbers = #tpu.dot_dimension_numbers<[1], [1], [0], [0], [0, 0, 1, 0], [], []>} : vector<16x16xbf16>, vector<8x16xbf16>, vector<16x8xf32> -> vector<16x8xf32>
    %cst_56 = arith.constant dense<0xFF800000> : vector<16xf32>
    %121 = vector.multi_reduction <maximumf>, %120, %cst_56 [1] : vector<16x8xf32> to vector<16xf32>
    %122 = vector.shape_cast %121 : vector<16xf32> to vector<16x1xf32>
    %123 = vector.broadcast %122 : vector<16x1xf32> to vector<16x8xf32>
    %124 = arith.subf %120, %123 : vector<16x8xf32>
    %125 = math.exp %124 : vector<16x8xf32>
    %cst_57 = arith.constant dense<0.000000e+00> : vector<16xf32>
    %126 = vector.multi_reduction <add>, %125, %cst_57 [1] : vector<16x8xf32> to vector<16xf32>
    %127 = vector.shape_cast %126 : vector<16xf32> to vector<16x1xf32>
    %128 = tpu.reciprocal %127 {approx = true} : vector<16x1xf32> -> vector<16x1xf32>
    %129 = vector.broadcast %128 : vector<16x1xf32> to vector<16x8xf32>
    %130 = arith.mulf %125, %129 : vector<16x8xf32>
    %131 = arith.truncf %130 : vector<16x8xf32> to vector<16x8xbf16>
    %132 = vector.extract_strided_slice %117 {offsets = [0, 0], sizes = [8, 16], strides = [1, 1]} : vector<8x32xbf16> to vector<8x16xbf16>
    %cst_58 = arith.constant dense<0.000000e+00> : vector<16x16xf32>
    %133 = tpu.matmul %131, %132, %cst_58 {dimension_numbers = #tpu.dot_dimension_numbers<[1], [0], [0], [1], [0, 0, 1, 1], [], []>} : vector<16x8xbf16>, vector<8x16xbf16>, vector<16x16xf32> -> vector<16x16xf32>
    %c0_59 = arith.constant 0 : index
    %c0_60 = arith.constant 0 : index
    %134 = vector.load %arg21[%c0_59, %c0_60] : memref<16x32xf32, #tpu.memory_space<vmem>>, vector<16x16xf32>
    tpu.vector_store %arg21[%c0_59, %c0_60], %133 {strides = array<i32>} : memref<16x32xf32, #tpu.memory_space<vmem>>, vector<16x16xf32>,
    %135 = vector.extract_strided_slice %115 {offsets = [0, 16], sizes = [16, 16], strides = [1, 1]} : vector<16x32xbf16> to vector<16x16xbf16>
    %136 = vector.extract_strided_slice %116 {offsets = [0, 16], sizes = [8, 16], strides = [1, 1]} : vector<8x32xbf16> to vector<8x16xbf16>
    %cst_61 = arith.constant dense<0.000000e+00> : vector<16x8xf32>
    %137 = tpu.matmul %135, %136, %cst_61 {dimension_numbers = #tpu.dot_dimension_numbers<[1], [1], [0], [0], [0, 0, 1, 0], [], []>} : vector<16x16xbf16>, vector<8x16xbf16>, vector<16x8xf32> -> vector<16x8xf32>
    %cst_62 = arith.constant dense<0xFF800000> : vector<16xf32>
    %138 = vector.multi_reduction <maximumf>, %137, %cst_62 [1] : vector<16x8xf32> to vector<16xf32>
    %139 = vector.shape_cast %138 : vector<16xf32> to vector<16x1xf32>
    %140 = vector.broadcast %139 : vector<16x1xf32> to vector<16x8xf32>
    %141 = arith.subf %137, %140 : vector<16x8xf32>
    %142 = math.exp %141 : vector<16x8xf32>
    %cst_63 = arith.constant dense<0.000000e+00> : vector<16xf32>
    %143 = vector.multi_reduction <add>, %142, %cst_63 [1] : vector<16x8xf32> to vector<16xf32>
    %144 = vector.shape_cast %143 : vector<16xf32> to vector<16x1xf32>
    %145 = tpu.reciprocal %144 {approx = true} : vector<16x1xf32> -> vector<16x1xf32>
    %146 = vector.broadcast %145 : vector<16x1xf32> to vector<16x8xf32>
    %147 = arith.mulf %142, %146 : vector<16x8xf32>
    %148 = arith.truncf %147 : vector<16x8xf32> to vector<16x8xbf16>
    %149 = vector.extract_strided_slice %117 {offsets = [0, 16], sizes = [8, 16], strides = [1, 1]} : vector<8x32xbf16> to vector<8x16xbf16>
    %cst_64 = arith.constant dense<0.000000e+00> : vector<16x16xf32>
    %150 = tpu.matmul %148, %149, %cst_64 {dimension_numbers = #tpu.dot_dimension_numbers<[1], [0], [0], [1], [0, 0, 1, 1], [], []>} : vector<16x8xbf16>, vector<8x16xbf16>, vector<16x16xf32> -> vector<16x16xf32>
    %c0_65 = arith.constant 0 : index
    %c16_66 = arith.constant 16 : index
    %151 = vector.load %arg21[%c0_65, %c16_66] : memref<16x32xf32, #tpu.memory_space<vmem>>, vector<16x16xf32>
    tpu.vector_store %arg21[%c0_65, %c16_66], %150 {strides = array<i32>} : memref<16x32xf32, #tpu.memory_space<vmem>>, vector<16x16xf32>,
    %c0_67 = arith.constant 0 : index
    %c0_68 = arith.constant 0 : index
    %152 = vector.load %arg21[%c0_67, %c0_68] : memref<16x32xf32, #tpu.memory_space<vmem>>, vector<16x32xf32>
    %153 = arith.truncf %152 : vector<16x32xf32> to vector<16x32xbf16>
    %cst_69 = arith.constant dense<0.000000e+00> : vector<16x32xf32>
    %154 = tpu.matmul %153, %111, %cst_69 {dimension_numbers = #tpu.dot_dimension_numbers<[1], [0], [0], [1], [0, 0, 1, 1], [], []>} : vector<16x32xbf16>, vector<32x32xbf16>, vector<16x32xf32> -> vector<16x32xf32>
    %155 = vector.broadcast %112 : vector<1x32xf32> to vector<16x32xf32>
    %156 = arith.addf %154, %155 : vector<16x32xf32>
    %157 = arith.addf %80, %156 : vector<16x32xf32>
    %c0_70 = arith.constant 0 : index
    %c0_71 = arith.constant 0 : index
    %158 = vector.load %arg14[%c0_70, %c0_71] : memref<1x32xf32, #tpu.memory_space<vmem>>, vector<1x32xf32>
    %c0_72 = arith.constant 0 : index
    %c0_73 = arith.constant 0 : index
    %159 = vector.load %arg15[%c0_72, %c0_73] : memref<1x32xf32, #tpu.memory_space<vmem>>, vector<1x32xf32>
    %cst_74 = arith.constant dense<0.000000e+00> : vector<16xf32>
    %160 = vector.multi_reduction <add>, %157, %cst_74 [1] : vector<16x32xf32> to vector<16xf32>
    %161 = vector.shape_cast %160 : vector<16xf32> to vector<16x1xf32>
    %cst_75 = arith.constant 3.200000e+01 : f32
    %162 = vector.broadcast %cst_75 : f32 to vector<16x1xf32>
    %163 = arith.divf %161, %162 : vector<16x1xf32>
    %164 = vector.broadcast %163 : vector<16x1xf32> to vector<16x32xf32>
    %165 = arith.subf %157, %164 : vector<16x32xf32>
    %166 = arith.mulf %165, %165 : vector<16x32xf32>
    %cst_76 = arith.constant dense<0.000000e+00> : vector<16xf32>
    %167 = vector.multi_reduction <add>, %166, %cst_76 [1] : vector<16x32xf32> to vector<16xf32>
    %168 = vector.shape_cast %167 : vector<16xf32> to vector<16x1xf32>
    %cst_77 = arith.constant 3.200000e+01 : f32
    %169 = vector.broadcast %cst_77 : f32 to vector<16x1xf32>
    %170 = arith.divf %168, %169 : vector<16x1xf32>
    %cst_78 = arith.constant 9.99999974E-6 : f32
    %171 = vector.broadcast %cst_78 : f32 to vector<16x1xf32>
    %172 = arith.addf %170, %171 : vector<16x1xf32>
    %173 = math.rsqrt %172 : vector<16x1xf32>
    %174 = vector.broadcast %173 : vector<16x1xf32> to vector<16x32xf32>
    %175 = arith.mulf %165, %174 : vector<16x32xf32>
    %176 = vector.broadcast %158 : vector<1x32xf32> to vector<16x32xf32>
    %177 = arith.mulf %175, %176 : vector<16x32xf32>
    %178 = vector.broadcast %159 : vector<1x32xf32> to vector<16x32xf32>
    %179 = arith.addf %177, %178 : vector<16x32xf32>
    %c0_79 = arith.constant 0 : index
    %c0_80 = arith.constant 0 : index
    %180 = vector.load %arg16[%c0_79, %c0_80] : memref<32x256xbf16, #tpu.memory_space<vmem>>, vector<32x256xbf16>
    %181 = arith.truncf %179 : vector<16x32xf32> to vector<16x32xbf16>
    %cst_81 = arith.constant dense<0.000000e+00> : vector<16x256xf32>
    %182 = tpu.matmul %181, %180, %cst_81 {dimension_numbers = #tpu.dot_dimension_numbers<[1], [0], [0], [1], [0, 0, 1, 1], [], []>} : vector<16x32xbf16>, vector<32x256xbf16>, vector<16x256xf32> -> vector<16x256xf32>
    %c0_82 = arith.constant 0 : index
    %c0_83 = arith.constant 0 : index
    %183 = vector.load %arg17[%c0_82, %c0_83] : memref<1x256xf32, #tpu.memory_space<vmem>>, vector<1x256xf32>
    %184 = vector.broadcast %183 : vector<1x256xf32> to vector<16x256xf32>
    %185 = arith.addf %182, %184 : vector<16x256xf32>
    %186 = vector.extract_strided_slice %185 {offsets = [0, 0], sizes = [16, 128], strides = [1, 1]} : vector<16x256xf32> to vector<16x128xf32>
    %187 = vector.extract_strided_slice %185 {offsets = [0, 128], sizes = [16, 128], strides = [1, 1]} : vector<16x256xf32> to vector<16x128xf32>
    %cst_84 = arith.constant 5.000000e-01 : f32
    %188 = vector.broadcast %cst_84 : f32 to vector<16x128xf32>
    %189 = arith.mulf %188, %187 : vector<16x128xf32>
    %cst_85 = arith.constant 4.471500e-02 : f32
    %190 = vector.broadcast %cst_85 : f32 to vector<16x128xf32>
    %191 = arith.mulf %190, %187 : vector<16x128xf32>
    %192 = arith.mulf %191, %187 : vector<16x128xf32>
    %193 = arith.mulf %192, %187 : vector<16x128xf32>
    %194 = arith.addf %187, %193 : vector<16x128xf32>
    %cst_86 = arith.constant 0.797884583 : f32
    %195 = vector.broadcast %cst_86 : f32 to vector<16x128xf32>
    %196 = arith.mulf %195, %194 : vector<16x128xf32>
    %197 = math.tanh %196 : vector<16x128xf32>
    %cst_87 = arith.constant 1.000000e+00 : f32
    %198 = vector.broadcast %cst_87 : f32 to vector<16x128xf32>
    %199 = arith.addf %198, %197 : vector<16x128xf32>
    %200 = arith.mulf %189, %199 : vector<16x128xf32>
    %201 = arith.mulf %186, %200 : vector<16x128xf32>
    %c0_88 = arith.constant 0 : index
    %c0_89 = arith.constant 0 : index
    %202 = vector.load %arg18[%c0_88, %c0_89] : memref<128x32xbf16, #tpu.memory_space<vmem>>, vector<128x32xbf16>
    %203 = arith.truncf %201 : vector<16x128xf32> to vector<16x128xbf16>
    %cst_90 = arith.constant dense<0.000000e+00> : vector<16x32xf32>
    %204 = tpu.matmul %203, %202, %cst_90 {dimension_numbers = #tpu.dot_dimension_numbers<[1], [0], [0], [1], [0, 0, 1, 1], [], []>} : vector<16x128xbf16>, vector<128x32xbf16>, vector<16x32xf32> -> vector<16x32xf32>
    %c0_91 = arith.constant 0 : index
    %c0_92 = arith.constant 0 : index
    %205 = vector.load %arg19[%c0_91, %c0_92] : memref<1x32xf32, #tpu.memory_space<vmem>>, vector<1x32xf32>
    %206 = vector.broadcast %205 : vector<1x32xf32> to vector<16x32xf32>
    %207 = arith.addf %204, %206 : vector<16x32xf32>
    %208 = arith.addf %157, %207 : vector<16x32xf32>
    %209 = vector.shape_cast %208 : vector<16x32xf32> to vector<1x16x32xf32>
    %210 = arith.truncf %209 : vector<1x16x32xf32> to vector<1x16x32xbf16>
    %c0_93 = arith.constant 0 : index
    %c0_94 = arith.constant 0 : index
    %c0_95 = arith.constant 0 : index
    %211 = vector.load %arg20[%c0_93, %c0_94, %c0_95] : memref<1x16x32xbf16, #tpu.memory_space<vmem>>, vector<1x16x32xbf16>
    tpu.vector_store %arg20[%c0_93, %c0_94, %c0_95], %210 {strides = array<i32>} : memref<1x16x32xbf16, #tpu.memory_space<vmem>>, vector<1x16x32xbf16>,
    return
  }
  func.func @transform_0(%arg0: i32) -> (i32, i32, i32) {
    %c0_i32 = arith.constant 0 : i32
    %c0_i32_0 = arith.constant 0 : i32
    %c0_i32_1 = arith.constant 0 : i32
    return %arg0, %c0_i32, %c0_i32_0 : i32, i32, i32
  }
  func.func @transform_1(%arg0: i32) -> (i32, i32, i32) {
    %c0_i32 = arith.constant 0 : i32
    %c0_i32_0 = arith.constant 0 : i32
    %c0_i32_1 = arith.constant 0 : i32
    return %arg0, %c0_i32, %c0_i32_0 : i32, i32, i32
  }
  func.func @transform_2(%arg0: i32) -> (i32, i32) {
    %c0_i32 = arith.constant 0 : i32
    %c0_i32_0 = arith.constant 0 : i32
    %c0_i32_1 = arith.constant 0 : i32
    return %c0_i32, %c0_i32_0 : i32, i32
  }
  func.func @transform_3(%arg0: i32) -> (i32, i32) {
    %c0_i32 = arith.constant 0 : i32
    %c0_i32_0 = arith.constant 0 : i32
    %c0_i32_1 = arith.constant 0 : i32
    return %c0_i32, %c0_i32_0 : i32, i32
  }
  func.func @transform_4(%arg0: i32) -> (i32, i32) {
    %c0_i32 = arith.constant 0 : i32
    %c0_i32_0 = arith.constant 0 : i32
    %c0_i32_1 = arith.constant 0 : i32
    return %c0_i32, %c0_i32_0 : i32, i32
  }
  func.func @transform_5(%arg0: i32) -> (i32, i32) {
    %c0_i32 = arith.constant 0 : i32
    %c0_i32_0 = arith.constant 0 : i32
    %c0_i32_1 = arith.constant 0 : i32
    return %c0_i32, %c0_i32_0 : i32, i32
  }
  func.func @transform_6(%arg0: i32) -> (i32, i32) {
    %c0_i32 = arith.constant 0 : i32
    %c0_i32_0 = arith.constant 0 : i32
    %c0_i32_1 = arith.constant 0 : i32
    return %c0_i32, %c0_i32_0 : i32, i32
  }
  func.func @transform_7(%arg0: i32) -> (i32, i32) {
    %c0_i32 = arith.constant 0 : i32
    %c0_i32_0 = arith.constant 0 : i32
    %c0_i32_1 = arith.constant 0 : i32
    return %c0_i32, %c0_i32_0 : i32, i32
  }
  func.func @transform_8(%arg0: i32) -> (i32, i32) {
    %c0_i32 = arith.constant 0 : i32
    %c0_i32_0 = arith.constant 0 : i32
    %c0_i32_1 = arith.constant 0 : i32
    return %c0_i32, %c0_i32_0 : i32, i32
  }
  func.func @transform_9(%arg0: i32) -> (i32, i32) {
    %c0_i32 = arith.constant 0 : i32
    %c0_i32_0 = arith.constant 0 : i32
    %c0_i32_1 = arith.constant 0 : i32
    return %c0_i32, %c0_i32_0 : i32, i32
  }
  func.func @transform_10(%arg0: i32) -> (i32, i32) {
    %c0_i32 = arith.constant 0 : i32
    %c0_i32_0 = arith.constant 0 : i32
    %c0_i32_1 = arith.constant 0 : i32
    return %c0_i32, %c0_i32_0 : i32, i32
  }
  func.func @transform_11(%arg0: i32) -> (i32, i32) {
    %c0_i32 = arith.constant 0 : i32
    %c0_i32_0 = arith.constant 0 : i32
    %c0_i32_1 = arith.constant 0 : i32
    return %c0_i32, %c0_i32_0 : i32, i32
  }
  func.func @transform_12(%arg0: i32) -> (i32, i32) {
    %c0_i32 = arith.constant 0 : i32
    %c0_i32_0 = arith.constant 0 : i32
    %c0_i32_1 = arith.constant 0 : i32
    return %c0_i32, %c0_i32_0 : i32, i32
  }
  func.func @transform_13(%arg0: i32) -> (i32, i32) {
    %c0_i32 = arith.constant 0 : i32
    %c0_i32_0 = arith.constant 0 : i32
    %c0_i32_1 = arith.constant 0 : i32
    return %c0_i32, %c0_i32_0 : i32, i32
  }
  func.func @transform_14(%arg0: i32) -> (i32, i32) {
    %c0_i32 = arith.constant 0 : i32
    %c0_i32_0 = arith.constant 0 : i32
    %c0_i32_1 = arith.constant 0 : i32
    return %c0_i32, %c0_i32_0 : i32, i32
  }
  func.func @transform_15(%arg0: i32) -> (i32, i32) {
    %c0_i32 = arith.constant 0 : i32
    %c0_i32_0 = arith.constant 0 : i32
    %c0_i32_1 = arith.constant 0 : i32
    return %c0_i32, %c0_i32_0 : i32, i32
  }
  func.func @transform_16(%arg0: i32) -> (i32, i32) {
    %c0_i32 = arith.constant 0 : i32
    %c0_i32_0 = arith.constant 0 : i32
    %c0_i32_1 = arith.constant 0 : i32
    return %c0_i32, %c0_i32_0 : i32, i32
  }
  func.func @transform_17(%arg0: i32) -> (i32, i32) {
    %c0_i32 = arith.constant 0 : i32
    %c0_i32_0 = arith.constant 0 : i32
    %c0_i32_1 = arith.constant 0 : i32
    return %c0_i32, %c0_i32_0 : i32, i32
  }
  func.func @transform_18(%arg0: i32) -> (i32, i32) {
    %c0_i32 = arith.constant 0 : i32
    %c0_i32_0 = arith.constant 0 : i32
    %c0_i32_1 = arith.constant 0 : i32
    return %c0_i32, %c0_i32_0 : i32, i32
  }
  func.func @transform_19(%arg0: i32) -> (i32, i32, i32) {
    %c0_i32 = arith.constant 0 : i32
    %c0_i32_0 = arith.constant 0 : i32
    %c0_i32_1 = arith.constant 0 : i32
    return %arg0, %c0_i32, %c0_i32_0 : i32, i32, i32
  }
}

</mosaic_0001>

<bundles_post_ra>
// kernel: tpu_custom_call.1
= control target key start
LH: loop header
LB: loop body
LE: loop exit
PB: predicated region body
PF: predicated region fallthrough
CT: control target
= control target key end

     0   :  { %s3683_s0 = inlined_call_operand.vmem [shape: bf16[2,16,32], index: 0, kind: input, shape index: {}]   ;;  %s3684_s1 = inlined_call_operand.hbm [shape: bf16[2,8,64], index: 1, kind: input, shape index: {}]   ;;  %s3685_s2 = inlined_call_operand.hbm [shape: f32[1,32], index: 2, kind: input, shape index: {}]   ;;  %s3686_s3 = inlined_call_operand.hbm [shape: f32[1,32], index: 3, kind: input, shape index: {}]   ;;  %s3687_s4 = inlined_call_operand.hbm [shape: bf16[32,96], index: 4, kind: input, shape index: {}]   ;;  %s3688_s5 = inlined_call_operand.hbm [shape: bf16[32,32], index: 5, kind: input, shape index: {}]   ;;  %s3689_s6 = inlined_call_operand.hbm [shape: f32[1,32], index: 6, kind: input, shape index: {}]   ;;  %s3690_s7 = inlined_call_operand.hbm [shape: f32[1,32], index: 7, kind: input, shape index: {}]   ;;  %s3691_s8 = inlined_call_operand.hbm [shape: f32[1,32], index: 8, kind: input, shape index: {}]   ;;  %s3692_s9 = inlined_call_operand.vmem [shape: bf16[32,32], index: 9, kind: input, shape index: {}]   ;;  %s3693_s10 = inlined_call_operand.vmem [shape: bf16[64,64], index: 10, kind: input, shape index: {}]   ;;  %s3694_s11 = inlined_call_operand.hbm [shape: bf16[32,32], index: 11, kind: input, shape index: {}]   ;;  %s3695_s12 = inlined_call_operand.vmem [shape: f32[1,32], index: 12, kind: input, shape index: {}]   ;;  %s3696_s13 = inlined_call_operand.vmem [shape: f32[1,32], index: 13, kind: input, shape index: {}]   ;;  %s3697_s14 = inlined_call_operand.vmem [shape: f32[1,32], index: 14, kind: input, shape index: {}]   ;;  %s3698_s15 = inlined_call_operand.vmem [shape: bf16[32,256], index: 15, kind: input, shape index: {}]   ;;  %s3699_s16 = inlined_call_operand.vmem [shape: f32[1,256], index: 16, kind: input, shape index: {}]   ;;  %s3700_s17 = inlined_call_operand.vmem [shape: bf16[128,32], index: 17, kind: input, shape index: {}]   ;;  %s3701_s18 = inlined_call_operand.vmem [shape: f32[1,32], index: 18, kind: input, shape index: {}]   ;;  %s3702_s19 = inlined_call_operand.hbm [shape: bf16[2,16,32], index: 19, kind: output, shape index: {}]  }
   0x1   :  { %3717 = sst [smem:[#allocation25_spill]] %s3683_s0 }
   0x2   :  { %3718 = sst [smem:[#allocation26_spill]] %s3684_s1 }
   0x3   :  { %3719 = sst [smem:[#allocation27_spill]] %s3685_s2 }
   0x4   :  { %3720 = sst [smem:[#allocation28_spill]] %s3686_s3 }
   0x5   :  { %3721 = sst [smem:[#allocation29_spill]] %s3687_s4 }
   0x6   :  { %3722 = sst [smem:[#allocation30_spill]] %s3688_s5 }
   0x7   :  { %3723 = sst [smem:[#allocation31_spill]] %s3689_s6 }
   0x8   :  { %3724 = sst [smem:[#allocation32_spill]] %s3690_s7 }
   0x9   :  { %3725 = sst [smem:[#allocation33_spill]] %s3696_s13 }
   0xa   :  { %3726 = sst [smem:[#allocation34_spill]] %s3697_s14 }
   0xb   :  { %3727 = sst [smem:[#allocation35_spill]] %s3699_s16 }
   0xc   :  { %3728 = sst [smem:[#allocation36_spill]] %s3700_s17 }
   0xd   :  { %3729 = sst [smem:[#allocation37_spill]] %s3701_s18 }
   0xe   :  { %3730 = sst [smem:[#allocation38_spill]] %s3702_s19 }
   0xf   :  { %24 = vsyncpa [#allocation4], 0 }
  0x10   :  { %26 = vsyncpa [#allocation4 + $0x1], 0 }
  0x11   :  { %27 = vsyncpa [#allocation7], 0 }
  0x12   :  { %28 = vsyncpa [#allocation10], 0 }
  0x13   :  { %29 = vsyncpa [#allocation13], 0 }
  0x14   :  { %30 = vsyncpa [#allocation16], 0 }
  0x15   :  { %31 = vsyncpa [#allocation5], 0 }
  0x16   :  { %33 = vsyncpa [#allocation5 + $0x1], 0  ;;  %s3067_s0 = smov 0   ;;  %s3069_s30 = smov 0  }
  0x17   :  { %s3071_s20 = smov 0   ;;  %s3073_s21 = smov 0  }
  0x18 LB: > { %s2945_s1 = smov [#allocation6]   ;;  %s3088_s2 = sadd.s32 4294967295, %s2943_s21   ;;  %s2943_s21 = sphi %s3073_s21, %s3772_s21   ;;  %s2939_s20 = sphi %s3071_s20, %s3771_s20   ;;  %s2935_s30 = sphi %s3069_s30, %s3770_s30   ;;  %s2931_s0 = sphi %s3067_s0, %s3769_s0  }
  0x19   : > { %s492_s22 = sshll.u32 %s2945_s1, 4  ;;  %p2153_p0 = scmp.ge.s32.totalorder %s2943_s21, 1  ;;  %s3093_s22 = int_to_ptr.vmem [resolvable:$true] %s492_s22 }
  0x1a   : > { %p3713_p1 = scmp.eq.s32.totalorder %s3088_s2, 0  ;;  %p479_p2 = scmp.lt.s32.totalorder %s2943_s21, 3 }
  0x1b   : > { %s2946_s24 = smov [#allocation9]   ;;  %s2947_s26 = smov [#allocation12]  }
  0x1c   : > { %p3095_p3 = pnand %p2153_p0, %p479_p2  ;;  %s513_s25 = sshll.u32 %s2946_s24, 4  ;;  %s3102_s25 = int_to_ptr.vmem [resolvable:$true] %s513_s25 }
  0x1d   : > { %s540_s27 = sshll.u32 %s2947_s26, 4  ;;  %s3733_s1 = sld [smem:[#allocation27_spill]]  ;;  %s3110_s27 = int_to_ptr.vmem [resolvable:$true] %s540_s27 }
  0x1e   : > { %s3731_s23 = scalar_select %p3095_p3, 1, 0 }
  0x1f   : > { %p2430_p5 = pneg %p3095_p3 }
  0x21   : > { %p3106_p6 = pnand %p2430_p5, %p3713_p1 }
  0x23   : > { %s2607_s19 = scalar_lea.hbm %s3733_s1, 16  ;;  %p3120_p8 = pneg %p3106_p6 }
  0x24   : > { %p2608_p7 = scmp.ne.s32.totalorder %s3733_s1, %s2607_s19  ;;  %p2614_p11 = scmp.lt.u32.totalorder %s2607_s19, %s3733_s1 }
  0x26   : > { %p2610_p9 = pnand %p3120_p8, %p2608_p7 }
  0x28   : > { %p2611_p10 = pneg %p2610_p9 }
  0x2a   : > { %p2616_p12 = pnand %p2614_p11, %p2611_p10 }
  0x2c   : > { %2619 = shalt.err (!%p2616_p12)
}
  0x2d   : > { %s2620_s16 = scalar_lea.vmem %s3093_s22, 16  ;;  %s2627_s18 = scalar_lea.vmem %s3093_s22, 32 }
  0x2e   : > { %p2621_p13 = scmp.ne.s32.totalorder %s3093_s22, %s2620_s16  ;;  %p2628_p5 = scmp.lt.s32.totalorder %s3093_s22, %s3093_s22 }
  0x2f   : > { %p2629_p7 = scmp.lt.s32.totalorder %s2627_s18, %s2620_s16 }
  0x30   : > { %p2623_p0 = pnand %p2621_p13, %p3120_p8 }
  0x31   : > { %p2630_p9 = por %p2629_p7, %p2628_p5 }
  0x32   : > { %p2624_p2 = pneg %p2623_p0 }
  0x34   : > { %p2631_p4 = pnand %p2630_p9, %p2624_p2 }
  0x36   : > { %2634 = shalt.err (!%p2631_p4)
}
  0x37   : > { %2433 = dma.hbm_to_vmem [thread:$0]  (!%p3106_p6), %s3733_s1, 16, %s3093_s22, [#allocation7]  }
  0x38   : > { %s3735_s4 = sld [smem:[#allocation29_spill]] }
  0x3e   : > { %s2635_s26 = scalar_lea.hbm %s3735_s4, 256 }
  0x3f   : > { %p2636_p10 = scmp.ne.s32.totalorder %s3735_s4, %s2635_s26  ;;  %p2642_p4 = scmp.lt.u32.totalorder %s2635_s26, %s3735_s4 }
  0x41   : > { %p2638_p11 = pnand %p2636_p10, %p3120_p8 }
  0x43   : > { %p2639_p12 = pneg %p2638_p11 }
  0x45   : > { %p2644_p13 = pnand %p2642_p4, %p2639_p12 }
  0x47   : > { %2647 = shalt.err (!%p2644_p13)
}
  0x48   : > { %s2648_s22 = scalar_lea.vmem %s3102_s25, 256  ;;  %p2656_p7 = scmp.lt.s32.totalorder %s3102_s25, %s3102_s25 }
  0x49   : > { %p2649_p0 = scmp.ne.s32.totalorder %s3102_s25, %s2648_s22  ;;  %p2657_p9 = scmp.lt.s32.totalorder %s2648_s22, %s2648_s22 }
  0x4b   : > { %p2651_p2 = pnand %p2649_p0, %p3120_p8  ;;  %p2658_p10 = por %p2657_p9, %p2656_p7 }
  0x4d   : > { %p2652_p5 = pneg %p2651_p2 }
  0x4f   : > { %p2659_p11 = pnand %p2658_p10, %p2652_p5 }
  0x51   : > { %2662 = shalt.err (!%p2659_p11)
}
  0x52   : > { %s3709_s13 = smov 64   ;;  %s3711_s14 = smov 4  }
  0x53   : > { %2439 = dma.hbm_to_vmem [thread:$0]  (!%p3106_p6), %s3735_s4, 256, %s3102_s25, [#allocation10], %s3709_s13, %s3709_s13, %s3711_s14  }
  0x54   : > { %s3736_s6 = sld [smem:[#allocation31_spill]] }
  0x5a   : > { %s2663_s26 = scalar_lea.hbm %s3736_s6, 16 }
  0x5b   : > { %p2664_p12 = scmp.ne.s32.totalorder %s3736_s6, %s2663_s26  ;;  %p2670_p0 = scmp.lt.u32.totalorder %s2663_s26, %s3736_s6 }
  0x5d   : > { %p2666_p4 = pnand %p2664_p12, %p3120_p8 }
  0x5f   : > { %p2667_p13 = pneg %p2666_p4 }
  0x61   : > { %p2672_p2 = pnand %p2670_p0, %p2667_p13 }
  0x63   : > { %2675 = shalt.err (!%p2672_p2)
}
  0x64   : > { %s2676_s25 = scalar_lea.vmem %s3110_s27, 16  ;;  %s2683_s17 = scalar_lea.vmem %s3110_s27, 32 }
  0x65   : > { %p2677_p5 = scmp.ne.s32.totalorder %s3110_s27, %s2676_s25  ;;  %p2684_p10 = scmp.lt.s32.totalorder %s3110_s27, %s3110_s27 }
  0x66   : > { %p2685_p11 = scmp.lt.s32.totalorder %s2683_s17, %s2676_s25 }
  0x67   : > { %p2679_p7 = pnand %p2677_p5, %p3120_p8 }
  0x68   : > { %p2686_p12 = por %p2685_p11, %p2684_p10 }
  0x69   : > { %p2680_p9 = pneg %p2679_p7 }
  0x6b   : > { %p2687_p4 = pnand %p2686_p12, %p2680_p9 }
  0x6d   : > { %2690 = shalt.err (!%p2687_p4)
}
  0x6e   : > { %2445 = dma.hbm_to_vmem [thread:$0]  (!%p3106_p6), %s3736_s6, 16, %s3110_s27, [#allocation13]  }
  0x6f   : > { %s2950_s28 = smov [#allocation15]   ;;  %s2951_s26 = smov [#allocation8]  }
  0x70   : > { %s562_s29 = sshll.u32 %s2950_s28, 4  ;;  %s503_s16 = sshll.u32 %s2951_s26, 4  ;;  %s563_s29 = int_to_ptr.vmem [resolvable:$true] %s562_s29  ;;  %s504_s16 = int_to_ptr.vmem [resolvable:$true] %s503_s16 }
  0x71   : > { %s2691_s25 = scalar_lea.hbm %s3691_s8, 16 }
  0x72   : > { %p2692_p13 = scmp.ne.s32.totalorder %s3691_s8, %s2691_s25  ;;  %p2698_p5 = scmp.lt.u32.totalorder %s2691_s25, %s3691_s8 }
  0x74   : > { %p2694_p0 = pnand %p2692_p13, %p3120_p8 }
  0x76   : > { %p2695_p2 = pneg %p2694_p0 }
  0x78   : > { %p2700_p7 = pnand %p2698_p5, %p2695_p2 }
  0x7a   : > { %2703 = shalt.err (!%p2700_p7)
}
  0x7b   : > { %s2704_s27 = scalar_lea.vmem %s563_s29, 16  ;;  %s2711_s19 = scalar_lea.vmem %s563_s29, 32 }
  0x7c   : > { %p2705_p9 = scmp.ne.s32.totalorder %s563_s29, %s2704_s27  ;;  %p2712_p12 = scmp.lt.s32.totalorder %s563_s29, %s563_s29 }
  0x7d   : > { %p2713_p4 = scmp.lt.s32.totalorder %s2711_s19, %s2704_s27 }
  0x7e   : > { %p2707_p10 = pnand %p2705_p9, %p3120_p8 }
  0x7f   : > { %p2714_p1 = por %p2713_p4, %p2712_p12 }
  0x80   : > { %p2708_p11 = pneg %p2707_p10 }
  0x82   : > { %p2715_p3 = pnand %p2714_p1, %p2708_p11 }
  0x84   : > { %2718 = shalt.err (!%p2715_p3)
}
  0x85   : > { %2451 = dma.hbm_to_vmem [thread:$0]  (!%p3106_p6), %s3691_s8, 16, %s563_s29, [#allocation16]  }
  0x86   : > { %s3737_s18 = sld [smem:[#allocation28_spill]] }
  0x8c   : > { %s2719_s22 = scalar_lea.hbm %s3737_s18, 16 }
  0x8d   : > { %p2720_p13 = scmp.ne.s32.totalorder %s3737_s18, %s2719_s22  ;;  %p2726_p3 = scmp.lt.u32.totalorder %s2719_s22, %s3737_s18 }
  0x8f   : > { %p2722_p0 = pnand %p2720_p13, %p3120_p8 }
  0x91   : > { %p2723_p1 = pneg %p2722_p0 }
  0x93   : > { %p2728_p2 = pnand %p2726_p3, %p2723_p1 }
  0x95   : > { %2731 = shalt.err (!%p2728_p2)
}
  0x96   : > { %s2732_s19 = scalar_lea.vmem %s504_s16, 16  ;;  %s2739_s29 = scalar_lea.vmem %s504_s16, 32 }
  0x97   : > { %p2733_p5 = scmp.ne.s32.totalorder %s504_s16, %s2732_s19  ;;  %p2740_p10 = scmp.lt.s32.totalorder %s504_s16, %s504_s16 }
  0x98   : > { %p2741_p11 = scmp.lt.s32.totalorder %s2739_s29, %s2732_s19 }
  0x99   : > { %p2735_p7 = pnand %p2733_p5, %p3120_p8 }
  0x9a   : > { %p2742_p12 = por %p2741_p11, %p2740_p10 }
  0x9b   : > { %p2736_p9 = pneg %p2735_p7 }
  0x9d   : > { %p2743_p4 = pnand %p2742_p12, %p2736_p9 }
  0x9f   : > { %2746 = shalt.err (!%p2743_p4)
}
  0xa0   : > { %2436 = dma.hbm_to_vmem [thread:$0]  (!%p3106_p6), %s3737_s18, 16, %s504_s16, [#allocation7]  }
  0xa1   : > { %s2952_s14 = smov [#allocation11]   ;;  %s2953_s22 = smov [#allocation14]  }
  0xa2   : > { %s526_s26 = sshll.u32 %s2952_s14, 4  ;;  %s551_s25 = sshll.u32 %s2953_s22, 4  ;;  %s527_s26 = int_to_ptr.vmem [resolvable:$true] %s526_s26  ;;  %s552_s25 = int_to_ptr.vmem [resolvable:$true] %s551_s25 }
  0xa3   : > { %s3738_s5 = sld [smem:[#allocation30_spill]] }
  0xa9   : > { %s2747_s27 = scalar_lea.hbm %s3738_s5, 256 }
  0xaa   : > { %p2748_p13 = scmp.ne.s32.totalorder %s3738_s5, %s2747_s27  ;;  %p2754_p3 = scmp.lt.u32.totalorder %s2747_s27, %s3738_s5 }
  0xac   : > { %p2750_p0 = pnand %p2748_p13, %p3120_p8 }
  0xae   : > { %p2751_p1 = pneg %p2750_p0 }
  0xb0   : > { %p2756_p2 = pnand %p2754_p3, %p2751_p1 }
  0xb2   : > { %2759 = shalt.err (!%p2756_p2)
}
  0xb3   : > { %s2760_s16 = scalar_lea.vmem %s527_s26, 256  ;;  %p2768_p10 = scmp.lt.s32.totalorder %s527_s26, %s527_s26 }
  0xb4   : > { %p2761_p5 = scmp.ne.s32.totalorder %s527_s26, %s2760_s16  ;;  %p2769_p11 = scmp.lt.s32.totalorder %s2760_s16, %s2760_s16 }
  0xb6   : > { %p2763_p7 = pnand %p2761_p5, %p3120_p8  ;;  %p2770_p12 = por %p2769_p11, %p2768_p10 }
  0xb8   : > { %p2764_p9 = pneg %p2763_p7 }
  0xba   : > { %p2771_p4 = pnand %p2770_p12, %p2764_p9 }
  0xbc   : > { %2774 = shalt.err (!%p2771_p4)
}
  0xbd   : > { %s3739_s28 = smov 4   ;;  %s3740_s14 = smov 64  }
  0xbe   : > { %2442 = dma.hbm_to_vmem [thread:$0]  (!%p3106_p6), %s3738_s5, 256, %s527_s26, [#allocation10], %s3740_s14, %s3740_s14, %s3739_s28  }
  0xbf   : > { %s3741_s7 = sld [smem:[#allocation32_spill]] }
  0xc5   : > { %s2775_s27 = scalar_lea.hbm %s3741_s7, 16 }
  0xc6   : > { %p2776_p13 = scmp.ne.s32.totalorder %s3741_s7, %s2775_s27  ;;  %p2782_p3 = scmp.lt.u32.totalorder %s2775_s27, %s3741_s7 }
  0xc8   : > { %p2778_p0 = pnand %p2776_p13, %p3120_p8 }
  0xca   : > { %p2779_p1 = pneg %p2778_p0 }
  0xcc   : > { %p2784_p2 = pnand %p2782_p3, %p2779_p1 }
  0xce   : > { %2787 = shalt.err (!%p2784_p2)
}
  0xcf   : > { %s2788_s4 = scalar_lea.vmem %s552_s25, 16  ;;  %s2795_s26 = scalar_lea.vmem %s552_s25, 32 }
  0xd0   : > { %p2789_p5 = scmp.ne.s32.totalorder %s552_s25, %s2788_s4  ;;  %p2796_p10 = scmp.lt.s32.totalorder %s552_s25, %s552_s25 }
  0xd1   : > { %p2797_p11 = scmp.lt.s32.totalorder %s2795_s26, %s2788_s4 }
  0xd2   : > { %p2791_p7 = pnand %p2789_p5, %p3120_p8 }
  0xd3   : > { %p2798_p12 = por %p2797_p11, %p2796_p10 }
  0xd4   : > { %p2792_p9 = pneg %p2791_p7 }
  0xd6   : > { %p2799_p4 = pnand %p2798_p12, %p2792_p9 }
  0xd8   : > { %2802 = shalt.err (!%p2799_p4)
}
  0xd9   : > { %2448 = dma.hbm_to_vmem [thread:$0]  (!%p3106_p6), %s3741_s7, 16, %s552_s25, [#allocation13]  }
  0xda   : > { %s2954_s1 = smov [#allocation17]   ;;  %s2803_s13 = scalar_lea.hbm %s3694_s11, 256 }
  0xdb   : > { %s578_s27 = sshll.u32 %s2954_s1, 4  ;;  %p2804_p13 = scmp.ne.s32.totalorder %s3694_s11, %s2803_s13  ;;  %s579_s27 = int_to_ptr.vmem [resolvable:$true] %s578_s27 }
  0xdc   : > { %p2810_p3 = scmp.lt.u32.totalorder %s2803_s13, %s3694_s11 }
  0xdd   : > { %p2806_p0 = pnand %p2804_p13, %p3120_p8 }
  0xdf   : > { %p2807_p1 = pneg %p2806_p0 }
  0xe1   : > { %p2812_p2 = pnand %p2810_p3, %p2807_p1 }
  0xe3   : > { %2815 = shalt.err (!%p2812_p2)
}
  0xe4   : > { %s2816_s25 = scalar_lea.vmem %s579_s27, 256  ;;  %p2824_p10 = scmp.lt.s32.totalorder %s579_s27, %s579_s27 }
  0xe5   : > { %p2817_p5 = scmp.ne.s32.totalorder %s579_s27, %s2816_s25  ;;  %p2825_p11 = scmp.lt.s32.totalorder %s2816_s25, %s2816_s25 }
  0xe7   : > { %p2819_p7 = pnand %p2817_p5, %p3120_p8  ;;  %p2826_p12 = por %p2825_p11, %p2824_p10 }
  0xe9   : > { %p2820_p9 = pneg %p2819_p7 }
  0xeb   : > { %p2827_p4 = pnand %p2826_p12, %p2820_p9 }
  0xed   : > { %2830 = shalt.err (!%p2827_p4)
}
  0xee   : > { %2454 = dma.hbm_to_vmem [thread:$0]  (!%p3106_p6), %s3694_s11, 256, %s579_s27, [#allocation16], %s3740_s14, %s3740_s14, %s3739_s28  }
  0xef   : > { %s2152_s3 = sadd.s32 4294967294, %s2943_s21   ;;  %s3290_s24 = sadd.s32 1, %s2943_s21  }
  0xf0   : > { %s69_s17 = ssub.s32 %s2943_s21, %s3290_s24  ;;  %s72_s1 = sadd.s32 1, %s2939_s20 }
  0xf1   : > { %p70_p8 = scmp.eq.s32.totalorder %s69_s17, 0  ;;  %p79_p13 = scmp.ne.s32.totalorder %s2939_s20, %s2935_s30 }
  0xf2   : > { %p80_p0 = scmp.eq.s32.totalorder %s2943_s21, 0  ;;  %p85_p1 = scmp.ne.s32.totalorder %s2935_s30, %s2931_s0 }
  0xf3   : > { %s3301_s19 = scalar_select %p70_p8, %s2939_s20, %s72_s1  }
  0xf4   : > { %p3303_p3 = por %p80_p0, %p79_p13  ;;  %p3743_p2 = scmp.eq.s32.totalorder %s3088_s2, 0 }
  0xf5   : > { %p466_p5 = scmp.eq.s32.totalorder %s3088_s2, 1  ;;  %p472_p7 = scmp.eq.s32.totalorder %s2152_s3, 1 }
  0xf6   : > { %p3309_p6 = por %p3743_p2, %p85_p1  ;;  %p2471_p9 = scmp.lt.s32.totalorder %s2943_s21, 2 }
  0xf7   : > { %s621_s14 = sand.u32 1, %s2939_s20   ;;  %p3316_p10 = por %p466_p5, %p79_p13 }
  0xf8   : > { %p3320_p11 = por %p472_p7, %p85_p1  ;;  %s2163_s16 = sshll.u32 %s621_s14, 2 }
  0xf9   : > { %s3745_s27 = scalar_select %p3316_p10, 1, 0 }
  0xfa   : > { %s3746_s13 = scalar_select %p3320_p11, 1, 0 }
  0xfb   : > { %s2164_s4 = sshll.u32 %s2943_s21, 6  ;;  %s3747_s5 = sld [smem:[#allocation26_spill]] }
  0xfc   : > { %s625_s3 = scalar_lea.vmem [#allocation3], %s2163_s16  ;;  %p3334_p12 = pnand %p2471_p9, %p3303_p3 }
  0xfd   : > { %s632_s17 = sshll.u32 %s625_s3, 4  ;;  %s622_s6 = scalar_lea.sflag [#allocation4], %s621_s14  ;;  %s3330_s17 = int_to_ptr.vmem [resolvable:$true] %s632_s17 }
  0xfe   : > { %p2833_p8 = pneg %p3334_p12 }
 0x101   : > { %s3328_s22 = scalar_lea.hbm %s3747_s5, %s2164_s4  ;;  %s2836_s26 = scalar_lea.hbm %s3747_s5, 128 }
 0x102   : > { %s2831_s7 = scalar_lea.hbm %s3328_s22, 64  ;;  %p2837_p1 = scmp.lt.u32.totalorder %s3328_s22, %s3747_s5 }
 0x103   : > { %p2832_p4 = scmp.ne.s32.totalorder %s3328_s22, %s2831_s7  ;;  %p2838_p3 = scmp.lt.u32.totalorder %s2836_s26, %s2831_s7 }
 0x104   : > { %p2840_p5 = scmp.lt.u32.totalorder %s2831_s7, %s3328_s22 }
 0x105   : > { %p2834_p13 = pnand %p2833_p8, %p2832_p4  ;;  %p2839_p2 = por %p2838_p3, %p2837_p1 }
 0x107   : > { %p2835_p0 = pneg %p2834_p13  ;;  %p2841_p7 = por %p2840_p5, %p2839_p2 }
 0x109   : > { %p2842_p9 = pnand %p2841_p7, %p2835_p0 }
 0x10b   : > { %2845 = shalt.err (!%p2842_p9)
}
 0x10c   : > { %s2846_s14 = scalar_lea.vmem %s3330_s17, 64  ;;  %s2955_s3 = smov [#allocation3]  }
 0x10d   : > { %p2847_p4 = scmp.ne.s32.totalorder %s3330_s17, %s2846_s14  ;;  %s2851_s16 = sshll.u32 %s2955_s3, 4  ;;  %s2852_s16 = int_to_ptr.vmem [resolvable:$false] %s2851_s16 }
 0x10e   : > { %s2853_s4 = scalar_lea.vmem %s2852_s16, 128  ;;  %p2854_p10 = scmp.lt.s32.totalorder %s3330_s17, %s2852_s16 }
 0x10f   : > { %p2849_p13 = pnand %p2847_p4, %p2833_p8  ;;  %p2855_p1 = scmp.lt.s32.totalorder %s2853_s4, %s2846_s14 }
 0x111   : > { %p2850_p11 = pneg %p2849_p13  ;;  %p2856_p3 = por %p2855_p1, %p2854_p10 }
 0x113   : > { %p2857_p2 = pnand %p2856_p3, %p2850_p11 }
 0x115   : > { %2860 = shalt.err (!%p2857_p2)
}
 0x116   : > { %2458 = dma.hbm_to_vmem [thread:$0]  (!%p3334_p12), %s3328_s22, 64, %s3330_s17, %s622_s6  }
 0x117   : > { %p3749_p0 = scmp.ne.s32.totalorder %s3731_s23, 0 }
 0x118   : > { %s3366_s7 = sand.u32 (!%p3749_p0), 1, %s2935_s30  }
 0x119   : > { %641 = sbr.rel (%p3749_p0) target bundleno = 4604 (0x11fc), region = 96  ;;  %s2166_s26 = sshll.u32 (!%p3749_p0), %s3366_s7, 2 }
 0x11a   : > { %s644_s29 = scalar_lea.sflag (!%p3749_p0), [#allocation4], %s3366_s7  ;;  %s3370_s25 = scalar_lea.vmem (!%p3749_p0), [#allocation3], %s2166_s26 }
 0x120   : > { %2906 = dma.done.wait (%p3309_p6), %s644_s29, 64  }
 0x121   : > { %2908 = vsyncadd (%p3309_p6), %s644_s29, 4294967232  ;;  %p3750_p10 = scmp.eq.s32.totalorder %s3088_s2, 0 }
 0x123   : > { %2910 = dma.done.wait (%p3750_p10), [#allocation7], 32   ;;  %p3751_p11 = pmov %p3750_p10 }
 0x124   : > { %p3752_p12 = pmov %p3750_p10 }
 0x125   : > { %2912 = vsyncadd (%p3751_p11), [#allocation7], 4294967264 }
 0x126   : > { %2914 = dma.done.wait (%p3752_p12), [#allocation10], 512   ;;  %p3753_p8 = pmov %p3750_p10 }
 0x128   : > { %2916 = vsyncadd (%p3753_p8), [#allocation10], 4294966784  ;;  %p3754_p5 = pmov %p3753_p8 }
 0x12a   : > { %2918 = dma.done.wait (%p3754_p5), [#allocation13], 32   ;;  %p3755_p7 = pmov %p3754_p5 }
 0x12b   : > { %p3756_p6 = pmov %p3754_p5 }
 0x12c   : > { %2920 = vsyncadd (%p3755_p7), [#allocation13], 4294967264 }
 0x12d   : > { %2922 = dma.done.wait (%p3756_p6), [#allocation16], 272   ;;  %p3757_p9 = pmov %p3754_p5 }
 0x12e   : > { %p739_p4 = scmp.lt.s32.totalorder %s3088_s2, 1  ;;  %s3758_s17 = sld [smem:[#allocation25_spill]]  ;;  %vm752_vm0 = vcmask 261120   ;;  %v2533_v15 = vld [vmem:[#allocation9] sm:$0xff]   ;;  %v2956_v16 = vmov 0.0   ;;  %v2534_v17 = vld [vmem:[#allocation9 + $0x8] sm:$0xff]  }
 0x12f   : > { %2924 = vsyncadd (%p3757_p9), [#allocation16], 4294967024  ;;  %2282 = vmatprep.subr.bf16.mxu0 %v2956_v16  ;;  %2302 = vmatprep.subr.bf16.mxu1 %v2956_v16  ;;  %vm2957_vm1 = vmmov 0   ;;  %v2178_v26 = vld [vmem:[#allocation6] ss:$0 sm:$0xff]  ;;  %s2958_s14 = smov 80  }
 0x130   : > { %s740_s6 = scalar_select %p739_p4, %s3088_s2, 1  ;;  %2283 = vmatpush3.bf16.msra.mxu0 %v2533_v15  ;;  %2286 = vmatprep.mubr.msk.bf16.mxu0 %vm2957_vm1, %v2956_v16  ;;  %v2179_v30 = vld [vmem:[#allocation8] ss:$0 sm:$0xff]  ;;  %vm869_vm2 = vcmask 130048   ;;  %vm1119_vm3 = vcmask 261248   ;;  %vm1326_vm4 = vcmask 523264  }
 0x131   : > { %2284 = vmatprep.subr.bf16.mxu0 %v2956_v16  ;;  %2304 = vmatprep.mubr.msk.bf16.mxu1 %vm2957_vm1, %v2956_v16  ;;  %s2959_s3 = smov 96   ;;  %s2960_s16 = smov 112   ;;  %vm1426_vm5 = vcmask 64512   ;;  %vm1456_vm6 = vcmask 1043456   ;;  %vm1974_vm7 = vcmask 257024  }
 0x132   : > { %s2232_s23 = sshll.u32 %s740_s6, 3  ;;  %s3716_s4 = smov 64  }
 0x133   : > { %s2962_s26 = smov 48   ;;  %s2963_s29 = smov 16  }
 0x134   : > { %s743_s1 = scalar_lea.vmem %s3758_s17, %s2232_s23  ;;  %2285 = vmatpush3.bf16.msra.mxu0 %v2534_v17  ;;  %s3759_s22 = sld [smem:[#allocation33_spill]] }
 0x135   : > { %v2237_v0 = vld [vmem:[%s743_s1] sm:$0xff]   ;;  %2290 = vmatprep.subr.bf16.mxu0 %v2956_v16  ;;  %s3762_s23 = sld [smem:[#allocation35_spill]]  ;;  %s2175_s28 = sshll.u32 %s3366_s7, 3 }
 0x136   : > { %v3397_v1 = vunpack.c.l.bf16 %v2237_v0  ;;  %v3399_v2 = vunpack.c.h.bf16 %v2237_v0  ;;  %p3765_p1 = scmp.ne.s32.totalorder %s3745_s27, 0 }
 0x138   : > { %v753_v3 = vsel %vm752_vm0, %v3397_v1, 0.0  ;;  %v756_v4 = vsel %vm752_vm0, %v3399_v2, 0.0 }
 0x139   : > { %754 = vadd.xlane.f32.xlu0 %v753_v3 }
 0x13d   : > { %757 = vadd.xlane.f32.xlu0 %v756_v4 }
 0x1c6   : > { %v755_v5 = vpop.xlane.xlu0 %754 }
 0x1c7   : > { %v760_v6 = vmul.f32 0.03125, %v755_v5 }
 0x1c9   : > { %v762_v7 = vsub.f32 %v3397_v1, %v760_v6 }
 0x1ca   : > { %v758_v8 = vpop.xlane.xlu0 %757 }
 0x1cb   : > { %v761_v9 = vmul.f32 0.03125, %v758_v8  ;;  %v764_v10 = vmul.f32 %v762_v7, %v762_v7 }
 0x1cd   : > { %v763_v11 = vsub.f32 %v3399_v2, %v761_v9  ;;  %v766_v12 = vsel %vm752_vm0, %v764_v10, 0.0 }
 0x1ce   : > { %767 = vadd.xlane.f32.xlu1 %v766_v12 }
 0x1cf   : > { %v765_v13 = vmul.f32 %v763_v11, %v763_v11 }
 0x1d1   : > { %v769_v14 = vsel %vm752_vm0, %v765_v13, 0.0 }
 0x1d2   : > { %770 = vadd.xlane.f32.xlu1 %v769_v14 }
 0x25b   : > { %v768_v18 = vpop.xlane.xlu1 %767 }
 0x25c   : > { %v772_v19 = vmul.f32 0.03125, %v768_v18 }
 0x25e   : > { %v774_v20 = vadd.f32 1e-05, %v772_v19 }
 0x25f   : > { %v771_v21 = vpop.xlane.xlu1 %770 }
 0x260   : > { %2559 = vrsqrt.f32 %v774_v20  ;;  %v773_v22 = vmul.f32 0.03125, %v771_v21 }
 0x262   : > { %v775_v23 = vadd.f32 1e-05, %v773_v22 }
 0x264   : > { %2561 = vrsqrt.f32 %v775_v23 }
 0x26a   : > { %v2560_v24 = vpop.eup %2559 }
 0x26b   : > { %v778_v25 = vmul.f32 %v2560_v24, %v762_v7 }
 0x26d   : > { %v786_v29 = vmul.f32 %v2178_v26, %v778_v25 }
 0x26e   : > { %v2562_v27 = vpop.eup %2561 }
 0x26f   : > { %v779_v28 = vmul.f32 %v2562_v27, %v763_v11  ;;  %v794_v32 = vadd.f32 %v2179_v30, %v786_v29 }
 0x271   : > { %v787_v31 = vmul.f32 %v2178_v26, %v779_v28 }
 0x273   : > { %v795_v33 = vadd.f32 %v2179_v30, %v787_v31 }
 0x275   : > { %v800_v34 = vpack.c.bf16 %v795_v33, %v794_v32 }
 0x277   : > { %2287 = vmatmul.mubr.msk.bf16.vlgmr.msra.gmra.mrb[0].mxu0 %vm752_vm0, %v800_v34 }
 0x278   : > { %2292 = vmatprep.mubr.msk.bf16.mxu0 %vm2957_vm1, %v2956_v16 }
 0x34a   : > { %v850_v35 = vpop.f32.mrb[0].mxu0 }
 0x34b   : > { %v2288_v36 = vpop.f32.mrb[1].mxu0  ;;  %v862_v38 = vmul.f32 0.25, %v850_v35 }
 0x34c   : > { %v853_v37 = vpop.f32.mrb[2].mxu0  ;;  %v2535_v36 = vld [vmem:[#allocation11] sm:$0xff]  }
 0x34d   : > { %v863_v39 = vmul.f32 0.25, %v853_v37  ;;  %v3420_v40 = vpack.c.bf16 %v853_v37, %v850_v35  ;;  %v2289_v41 = vpop.f32.mrb[3].mxu0 }
 0x34f   : > { %v864_v42 = vpack.c.bf16 %v863_v39, %v862_v38  ;;  %992 = vrot.lane.b32.xlu1 %v3420_v40, %s2958_s14  ;;  %867 = vrot.lane.b32.xlu0 %v3420_v40, %s2959_s3  ;;  %v2536_v39 = vld [vmem:[#allocation11 + $0x8] sm:$0xff]  }
 0x353   : > { %990 = vrot.lane.b32.xlu1 %v864_v42, %s2960_s16 }
 0x3c1   : > { %v993_v43 = vpop.permute.xlu1 %992  ;;  %v868_v44 = vpop.permute.xlu0 %867 }
 0x3c2   : > { %v874_v45 = vsel %vm869_vm2, %v868_v44, 0  ;;  %v998_v46 = vsel %vm869_vm2, %v993_v43, 0 }
 0x3c3   : > { %2291 = vmatpush3.bf16.xpose.msra.mxu0 %v874_v45  ;;  %2303 = vmatpush3.bf16.xpose.msra.mxu1 %v998_v46 }
 0x3c4   : > { %2296 = vmatprep.subr.bf16.mxu0 %v2956_v16  ;;  %2314 = vmatprep.subr.bf16.mxu1 %v2956_v16 }
 0x3c5   : > { %v991_v47 = vpop.permute.xlu1 %990 }
 0x3ca   : > { %2293 = vmatmul.mubr.msk.bf16.vlgmr.msra.gmra.mrb[4].mxu0 %vm869_vm2, %v864_v42  ;;  %2305 = vmatmul.mubr.msk.bf16.vlgmr.msra.gmra.mrb[0].mxu1 %vm869_vm2, %v991_v47 }
 0x3cb   : > { %2298 = vmatprep.mubr.msk.bf16.mxu0 %vm2957_vm1, %v2956_v16  ;;  %2318 = vmatprep.mubr.msk.bf16.mxu1 %vm2957_vm1, %v2956_v16 }
 0x3cc   : > { %2315 = vmatpush3.bf16.msra.mxu1 %v2535_v36 }
 0x3cd   : > { %2316 = vmatprep.subr.bf16.mxu1 %v2956_v16 }
 0x3d0   : > { %2317 = vmatpush3.bf16.msra.mxu1 %v2536_v39 }
 0x3d1   : > { %2330 = vmatprep.subr.bf16.mxu1 %v2956_v16 }
 0x49d   : > { %v910_v48 = vpop.f32.mrb[4].mxu0  ;;  %v1034_v49 = vpop.f32.mrb[0].mxu1 }
 0x49e   : > { %v2294_v50 = vpop.f32.mrb[5].mxu0  ;;  %v2306_v51 = vpop.f32.mrb[1].mxu1  ;;  %v917_v52 = vsel %vm869_vm2, %v910_v48, -inf  ;;  %v1041_v58 = vsel %vm869_vm2, %v1034_v49, -inf }
 0x49f   : > { %v1037_v53 = vpop.f32.mrb[2].mxu1  ;;  %918 = vmax.xlane.f32.xlu1 %v917_v52  ;;  %v913_v54 = vpop.f32.mrb[6].mxu0  ;;  %v2187_v50 = vld [vmem:[#allocation12] ss:$0 sm:$0xff] }
 0x4a0   : > { %v2295_v55 = vpop.f32.mrb[7].mxu0  ;;  %v2307_v56 = vpop.f32.mrb[3].mxu1  ;;  %v920_v57 = vsel %vm869_vm2, %v913_v54, -inf  ;;  %v1044_v59 = vsel %vm869_vm2, %v1037_v53, -inf }
 0x4a1   : > { %921 = vmax.xlane.f32.xlu0 %v920_v57 }
 0x4a5   : > { %1042 = vmax.xlane.f32.xlu0 %v1041_v58 }
 0x4a9   : > { %1045 = vmax.xlane.f32.xlu0 %v1044_v59 }
 0x52c   : > { %v919_v60 = vpop.xlane.xlu1 %918 }
 0x52d   : > { %v923_v61 = vsub.f32 %v910_v48, %v919_v60 }
 0x52e   : > { %v922_v62 = vpop.xlane.xlu0 %921 }
 0x52f   : > { %v925_v63 = vmul.f32 1.442695, %v923_v61  ;;  %v924_v0 = vsub.f32 %v913_v54, %v922_v62 }
 0x531   : > { %2563 = vpow2.f32 %v925_v63  ;;  %v927_v3 = vmul.f32 1.442695, %v924_v0 }
 0x532   : > { %v1043_v4 = vpop.xlane.xlu0 %1042 }
 0x533   : > { %2565 = vpow2.f32 %v927_v3  ;;  %v1047_v5 = vsub.f32 %v1034_v49, %v1043_v4 }
 0x535   : > { %v1049_v6 = vmul.f32 1.442695, %v1047_v5 }
 0x536   : > { %v1046_v7 = vpop.xlane.xlu0 %1045 }
 0x537   : > { %2567 = vpow2.f32 %v1049_v6  ;;  %v1048_v8 = vsub.f32 %v1037_v53, %v1046_v7  ;;  %v2537_v7 = vld [vmem:[%s3693_s10] sm:$0xff]  }
 0x539   : > { %v1051_v9 = vmul.f32 1.442695, %v1048_v8  ;;  %v2538_v8 = vld [vmem:[%s3693_s10 + $0x8] sm:$0xff]  }
 0x53b   : > { %v2564_v10 = vpop.eup %2563  ;;  %2569 = vpow2.f32 %v1051_v9  ;;  %v2539_v9 = vld [vmem:[%s3693_s10 + $0x10] sm:$0xff]  }
 0x53c   : > { %v929_v11 = vsel %vm869_vm2, %v2564_v10, 0.0 }
 0x53d   : > { %v2566_v12 = vpop.eup %2565  ;;  %930 = vadd.xlane.f32.xlu1 %v929_v11  ;;  %v2541_v11 = vld [vmem:[%s3692_s9] sm:$0xff]  }
 0x53e   : > { %v932_v13 = vsel %vm869_vm2, %v2566_v12, 0.0 }
 0x53f   : > { %933 = vadd.xlane.f32.xlu0 %v932_v13  ;;  %v2542_v13 = vld [vmem:[%s3692_s9 + $0x8] sm:$0xff]  }
 0x541   : > { %v2568_v14 = vpop.eup %2567 }
 0x542   : > { %v1053_v15 = vsel %vm869_vm2, %v2568_v14, 0.0 }
 0x543   : > { %1054 = vadd.xlane.f32.xlu1 %v1053_v15 }
 0x545   : > { %v2570_v17 = vpop.eup %2569 }
 0x546   : > { %v1056_v18 = vsel %vm869_vm2, %v2570_v17, 0.0 }
 0x547   : > { %1057 = vadd.xlane.f32.xlu0 %v1056_v18 }
 0x554   : > { %940 = vrot.lane.b32.xlu1 %v3420_v40, %s3716_s4 }
 0x55d   : > { %1064 = vrot.lane.b32.xlu0 %v3420_v40, %s2962_s26  ;;  %s3764_s26 = sld [smem:[#allocation38_spill]] }
 0x5ca   : > { %v931_v19 = vpop.xlane.xlu1 %930 }
 0x5cb   : > { %2571 = vrcp.f32 %v931_v19 }
 0x5cc   : > { %v934_v20 = vpop.xlane.xlu0 %933 }
 0x5cd   : > { %2573 = vrcp.f32 %v934_v20 }
 0x5d0   : > { %v1055_v21 = vpop.xlane.xlu1 %1054 }
 0x5d1   : > { %2575 = vrcp.f32 %v1055_v21 }
 0x5d4   : > { %v941_v22 = vpop.permute.xlu1 %940  ;;  %v1058_v23 = vpop.xlane.xlu0 %1057 }
 0x5d5   : > { %v2572_v24 = vpop.eup %2571  ;;  %2577 = vrcp.f32 %v1058_v23  ;;  %2297 = vmatpush3.bf16.msra.mxu0 %v941_v22  ;;  %v2191_v23 = vld [vmem:[#allocation14] ss:$0 sm:$0xff] }
 0x5d6   : > { %2308 = vmatprep.subr.bf16.mxu0 %v2956_v16  ;;  %v937_v26 = vmul.f32 %v2572_v24, %v2564_v10  ;;  %v2540_v10 = vld [vmem:[%s3693_s10 + $0x18] sm:$0xff]  }
 0x5d7   : > { %v2574_v25 = vpop.eup %2573 }
 0x5d8   : > { %v938_v27 = vmul.f32 %v2574_v25, %v2566_v12  ;;  %v1065_v29 = vpop.permute.xlu0 %1064  ;;  %v749_v12 = vld [vmem:[%s3370_s25] sm:$0xf] }
 0x5da   : > { %v939_v28 = vpack.c.bf16 %v938_v27, %v937_v26  ;;  %v2192_v27 = vld [vmem:[#allocation15] ss:$0 sm:$0xff] }
 0x5db   : > { %v2576_v30 = vpop.eup %2575 }
 0x5dc   : > { %2299 = vmatmul.mubr.msk.bf16.vlgmr.msra.gmra.mrb[8].mxu0 %vm869_vm2, %v939_v28  ;;  %v1061_v32 = vmul.f32 %v2576_v30, %v2568_v14 }
 0x5dd   : > { %2309 = vmatpush3.bf16.msra.mxu0 %v1065_v29  ;;  %2310 = vmatprep.mubr.msk.bf16.mxu0 %vm2957_vm1, %v2956_v16 }
 0x5de   : > { %2322 = vmatprep.subr.bf16.mxu0 %v2956_v16 }
 0x5df   : > { %v2578_v31 = vpop.eup %2577 }
 0x5e0   : > { %v1062_v33 = vmul.f32 %v2578_v31, %v2570_v17 }
 0x5e2   : > { %v1063_v34 = vpack.c.bf16 %v1062_v33, %v1061_v32 }
 0x5e4   : > { %2311 = vmatmul.mubr.msk.bf16.vlgmr.msra.gmra.mrb[12].mxu0 %vm869_vm2, %v1063_v34 }
 0x5e5   : > { %2326 = vmatprep.mubr.msk.bf16.mxu0 %vm2957_vm1, %v2956_v16  ;;  %2323 = vmatpush3.bf16.msra.mxu0 %v2541_v11 }
 0x5e6   : > { %2324 = vmatprep.subr.bf16.mxu0 %v2956_v16 }
 0x5e9   : > { %2325 = vmatpush3.bf16.msra.mxu0 %v2542_v13 }
 0x5ea   : > { %2342 = vmatprep.subr.bf16.mxu0 %v2956_v16 }
 0x6af   : > { %v980_v35 = vpop.f32.mrb[8].mxu0 }
 0x6b0   : > { %987 = vst.msk [vmem:[#allocation2] sm:$0xff] %vm869_vm2, %v980_v35  ;;  %v2300_v37 = vpop.f32.mrb[9].mxu0 }
 0x6b1   : > { %v983_v38 = vpop.f32.mrb[10].mxu0 }
 0x6b2   : > { %988 = vst.msk [vmem:[#allocation2 + $0x8] sm:$0xff] %vm869_vm2, %v983_v38  ;;  %v2301_v40 = vpop.f32.mrb[11].mxu0 }
 0x6b7   : > { %v1104_v41 = vpop.f32.mrb[12].mxu0 }
 0x6b8   : > { %1113 = vrot.lane.b32.xlu1 %v1104_v41, %s2963_s29  ;;  %v2312_v42 = vpop.f32.mrb[13].mxu0 }
 0x6b9   : > { %v1107_v43 = vpop.f32.mrb[14].mxu0 }
 0x6ba   : > { %v2313_v44 = vpop.f32.mrb[15].mxu0 }
 0x6bc   : > { %1115 = vrot.lane.b32.xlu1 %v1107_v43, %s2963_s29 }
 0x72a   : > { %v1114_v45 = vpop.permute.xlu1 %1113 }
 0x72b   : > { %1120 = vst.msk [vmem:[#allocation2] sm:$0xff] %vm1119_vm3, %v1114_v45 }
 0x72e   : > { %v1116_v46 = vpop.permute.xlu1 %1115 }
 0x72f   : > { %1121 = vst.msk [vmem:[#allocation2 + $0x8] sm:$0xff] %vm1119_vm3, %v1116_v46 }
 0x732   : > { %v1122_v47 = vld [vmem:[#allocation2] sm:$0xff] }
 0x736   : > { %v1123_v48 = vld [vmem:[#allocation2 + $0x8] sm:$0xff] }
 0x737   : > { %v1124_v49 = vpack.c.bf16 %v1123_v48, %v1122_v47 }
 0x739   : > { %2319 = vmatmul.mubr.msk.bf16.vlgmr.msra.gmra.mrb[4].mxu1 %vm752_vm0, %v1124_v49 }
 0x73a   : > { %2338 = vmatprep.mubr.msk.bf16.mxu1 %vm2957_vm1, %v2956_v16  ;;  %2331 = vmatpush3.bf16.msra.mxu1 %v2537_v7 }
 0x73b   : > { %2332 = vmatprep.subr.bf16.mxu1 %v2956_v16 }
 0x73e   : > { %2333 = vmatpush3.bf16.msra.mxu1 %v2538_v8 }
 0x73f   : > { %2334 = vmatprep.subr.bf16.mxu1 %v2956_v16 }
 0x742   : > { %2335 = vmatpush3.bf16.msra.mxu1 %v2539_v9 }
 0x743   : > { %2336 = vmatprep.subr.bf16.mxu1 %v2956_v16 }
 0x746   : > { %2337 = vmatpush3.bf16.msra.mxu1 %v2540_v10 }
 0x747   : > { %2354 = vmatprep.subr.bf16.mxu1 %v2956_v16 }
 0x749   : > { %2339 = vmatmul.mubr.msk.bf16.vlgmr.msra.gmra.mrb[8].mxu1 %vm1326_vm4, %v749_v12 }
 0x74a   : > { %2356 = vmatprep.mubr.msk.bf16.mxu1 %vm2957_vm1, %v2956_v16 }
 0x80c   : > { %v1180_v51 = vpop.f32.mrb[4].mxu1 }
 0x80d   : > { %v1181_v52 = vadd.f32 %v2187_v50, %v1180_v51  ;;  %v2320_v53 = vpop.f32.mrb[5].mxu1 }
 0x80e   : > { %v1183_v54 = vpop.f32.mrb[6].mxu1 }
 0x80f   : > { %v3468_v55 = vadd.f32 %v3397_v1, %v1181_v52  ;;  %v1184_v56 = vadd.f32 %v2187_v50, %v1183_v54  ;;  %v2321_v57 = vpop.f32.mrb[7].mxu1 }
 0x811   : > { %v3471_v58 = vadd.f32 %v3399_v2, %v1184_v56  ;;  %v1191_v59 = vsel %vm752_vm0, %v3468_v55, 0.0 }
 0x812   : > { %1192 = vadd.xlane.f32.xlu1 %v1191_v59 }
 0x813   : > { %v1194_v60 = vsel %vm752_vm0, %v3471_v58, 0.0 }
 0x814   : > { %1195 = vadd.xlane.f32.xlu0 %v1194_v60 }
 0x81c   : > { %v1364_v32 = vpop.f32.mrb[8].mxu1 }
 0x81d   : > { %v3511_v33 = vpack.c.bf16 %v1364_v32, %v1364_v32  ;;  %v2340_v34 = vpop.f32.mrb[9].mxu1 }
 0x81e   : > { %v1367_v35 = vpop.f32.mrb[10].mxu1 }
 0x81f   : > { %v2341_v36 = vpop.f32.mrb[11].mxu1  ;;  %v1383_v37 = vsel %vm869_vm2, %v3511_v33, 0 }
 0x823   : > { %1506 = vrot.lane.b32.xlu1 %v3511_v33, %s2960_s16 }
 0x89f   : > { %v1193_v61 = vpop.xlane.xlu1 %1192 }
 0x8a0   : > { %v1197_v62 = vmul.f32 0.03125, %v1193_v61 }
 0x8a1   : > { %v1196_v63 = vpop.xlane.xlu0 %1195 }
 0x8a2   : > { %v1199_v0 = vsub.f32 %v3468_v55, %v1197_v62  ;;  %v1198_v1 = vmul.f32 0.03125, %v1196_v63 }
 0x8a3   : > { %v1507_v38 = vpop.permute.xlu1 %1506 }
 0x8a4   : > { %v1200_v3 = vsub.f32 %v3471_v58, %v1198_v1  ;;  %v1201_v4 = vmul.f32 %v1199_v0, %v1199_v0  ;;  %v1512_v39 = vsel %vm869_vm2, %v1507_v38, 0 }
 0x8a5   : > { %2355 = vmatpush3.bf16.xpose.msra.mxu1 %v1512_v39  ;;  %v2543_v39 = vld [vmem:[#allocation17] sm:$0xff]  }
 0x8a6   : > { %v1203_v2 = vsel %vm752_vm0, %v1201_v4, 0.0  ;;  %v1202_v5 = vmul.f32 %v1200_v3, %v1200_v3  ;;  %2366 = vmatprep.subr.bf16.mxu1 %v2956_v16 }
 0x8a7   : > { %1204 = vadd.xlane.f32.xlu0 %v1203_v2 }
 0x8a8   : > { %v1206_v6 = vsel %vm752_vm0, %v1202_v5, 0.0 }
 0x8ab   : > { %1207 = vadd.xlane.f32.xlu0 %v1206_v6 }
 0x934   : > { %v1205_v14 = vpop.xlane.xlu0 %1204 }
 0x935   : > { %v1209_v15 = vmul.f32 0.03125, %v1205_v14 }
 0x937   : > { %v1211_v17 = vadd.f32 1e-05, %v1209_v15 }
 0x938   : > { %v1208_v18 = vpop.xlane.xlu0 %1207 }
 0x939   : > { %2579 = vrsqrt.f32 %v1211_v17  ;;  %v1210_v19 = vmul.f32 0.03125, %v1208_v18 }
 0x93b   : > { %v1212_v20 = vadd.f32 1e-05, %v1210_v19 }
 0x93d   : > { %2581 = vrsqrt.f32 %v1212_v20 }
 0x943   : > { %v2580_v21 = vpop.eup %2579 }
 0x944   : > { %v1215_v22 = vmul.f32 %v2580_v21, %v1199_v0 }
 0x946   : > { %v1223_v25 = vmul.f32 %v2191_v23, %v1215_v22 }
 0x947   : > { %v2582_v24 = vpop.eup %2581 }
 0x948   : > { %v1216_v26 = vmul.f32 %v2582_v24, %v1200_v3  ;;  %v1231_v29 = vadd.f32 %v2192_v27, %v1223_v25 }
 0x94a   : > { %v1224_v28 = vmul.f32 %v2191_v23, %v1216_v26 }
 0x94c   : > { %v1232_v30 = vadd.f32 %v2192_v27, %v1224_v28 }
 0x94e   : > { %v1237_v31 = vpack.c.bf16 %v1232_v30, %v1231_v29 }
 0x950   : > { %2327 = vmatmul.mubr.msk.bf16.vlgmr.msra.gmra.mrb[16].mxu0 %vm752_vm0, %v1237_v31 }
 0x951   : > { %2344 = vmatprep.mubr.msk.bf16.mxu0 %vm2957_vm1, %v2956_v16  ;;  %2343 = vmatpush3.bf16.xpose.msra.mxu0 %v1383_v37 }
 0x952   : > { %2348 = vmatprep.subr.bf16.mxu0 %v2956_v16 }
 0xa23   : > { %v1287_v40 = vpop.f32.mrb[16].mxu0 }
 0xa24   : > { %v2328_v41 = vpop.f32.mrb[17].mxu0  ;;  %v1375_v43 = vmul.f32 0.25, %v1287_v40 }
 0xa25   : > { %v1290_v42 = vpop.f32.mrb[18].mxu0 }
 0xa26   : > { %v1376_v44 = vmul.f32 0.25, %v1290_v42  ;;  %v2329_v45 = vpop.f32.mrb[19].mxu0  ;;  %v2544_v42 = vld [vmem:[#allocation17 + $0x8] sm:$0xff]  }
 0xa28   : > { %v1377_v46 = vpack.c.bf16 %v1376_v44, %v1375_v43 }
 0xa2a   : > { %1504 = vrot.lane.b32.xlu0 %v1377_v46, %s2960_s16  ;;  %2345 = vmatmul.mubr.msk.bf16.vlgmr.msra.gmra.mrb[20].mxu0 %vm869_vm2, %v1377_v46  ;;  %s738_s16 = scalar_lea.vmem [#allocation18], %s2175_s28  ;;  %s2965_s28 = smov [#allocation18]  }
 0xa2b   : > { %2350 = vmatprep.mubr.msk.bf16.mxu0 %vm2957_vm1, %v2956_v16  ;;  %s1991_s4 = sshll.u32 %s738_s16, 4  ;;  %s3637_s4 = int_to_ptr.vmem [resolvable:$true] %s1991_s4 }
 0xa9c   : > { %v1505_v47 = vpop.permute.xlu0 %1504 }
 0xa9d   : > { %2357 = vmatmul.mubr.msk.bf16.vlgmr.msra.gmra.mrb[12].mxu1 %vm869_vm2, %v1505_v47 }
 0xa9e   : > { %2370 = vmatprep.mubr.msk.bf16.mxu1 %vm2957_vm1, %v2956_v16  ;;  %2367 = vmatpush3.bf16.msra.mxu1 %v2543_v39 }
 0xa9f   : > { %2368 = vmatprep.subr.bf16.mxu1 %v2956_v16 }
 0xaa2   : > { %2369 = vmatpush3.bf16.msra.mxu1 %v2544_v42 }
 0xaa3   : > { %2374 = vmatprep.subr.bf16.mxu1 %v2956_v16 }
 0xafd   : > { %v1419_v48 = vpop.f32.mrb[20].mxu0 }
 0xafe   : > { %v2346_v49 = vpop.f32.mrb[21].mxu0  ;;  %v1427_v50 = vsel %vm1426_vm5, %v1419_v48, -inf }
 0xaff   : > { %1428 = vmax.xlane.f32.xlu1 %v1427_v50  ;;  %v1422_v51 = vpop.f32.mrb[22].mxu0 }
 0xb00   : > { %v2347_v52 = vpop.f32.mrb[23].mxu0  ;;  %v1430_v53 = vsel %vm1426_vm5, %v1422_v51, -inf }
 0xb01   : > { %1431 = vmax.xlane.f32.xlu0 %v1430_v53  ;;  %v2205_v52 = vld [vmem:[%s3695_s12] ss:$0 sm:$0xff] }
 0xb70   : > { %v1548_v54 = vpop.f32.mrb[12].mxu1 }
 0xb71   : > { %v2358_v56 = vpop.f32.mrb[13].mxu1  ;;  %v1555_v57 = vsel %vm1426_vm5, %v1548_v54, -inf }
 0xb72   : > { %v1551_v59 = vpop.f32.mrb[14].mxu1  ;;  %1556 = vmax.xlane.f32.xlu1 %v1555_v57 }
 0xb73   : > { %v2359_v60 = vpop.f32.mrb[15].mxu1  ;;  %v1558_v61 = vsel %vm1426_vm5, %v1551_v59, -inf }
 0xb74   : > { %1559 = vmax.xlane.f32.xlu0 %v1558_v61 }
 0xb8c   : > { %v1429_v62 = vpop.xlane.xlu1 %1428 }
 0xb8d   : > { %v1433_v63 = vsub.f32 %v1419_v48, %v1429_v62 }
 0xb8e   : > { %v1432_v0 = vpop.xlane.xlu0 %1431 }
 0xb8f   : > { %v1435_v1 = vmul.f32 1.442695, %v1433_v63  ;;  %v1434_v3 = vsub.f32 %v1422_v51, %v1432_v0 }
 0xb91   : > { %2583 = vpow2.f32 %v1435_v1  ;;  %v1437_v4 = vmul.f32 1.442695, %v1434_v3 }
 0xb93   : > { %2585 = vpow2.f32 %v1437_v4 }
 0xb9b   : > { %v2584_v2 = vpop.eup %2583 }
 0xb9c   : > { %v1439_v5 = vsel %vm1426_vm5, %v2584_v2, 0.0 }
 0xb9d   : > { %v2586_v6 = vpop.eup %2585  ;;  %1440 = vadd.xlane.f32.xlu1 %v1439_v5 }
 0xb9e   : > { %v1442_v7 = vsel %vm1426_vm5, %v2586_v6, 0.0 }
 0xb9f   : > { %1443 = vadd.xlane.f32.xlu0 %v1442_v7 }
 0xbff   : > { %v1557_v8 = vpop.xlane.xlu1 %1556 }
 0xc00   : > { %v1561_v9 = vsub.f32 %v1548_v54, %v1557_v8 }
 0xc01   : > { %v1560_v10 = vpop.xlane.xlu0 %1559 }
 0xc02   : > { %v1563_v11 = vmul.f32 1.442695, %v1561_v9  ;;  %v1562_v12 = vsub.f32 %v1551_v59, %v1560_v10  ;;  %v2547_v9 = vld [vmem:[%s3698_s15 + $0x4] ss:$8 sps:$4 sm:$0xff]   ;;  %v2545_v10 = vld [vmem:[%s3698_s15] ss:$8 sps:$4 sm:$0xff]  }
 0xc04   : > { %2587 = vpow2.f32 %v1563_v11  ;;  %v1565_v13 = vmul.f32 1.442695, %v1562_v12  ;;  %v2548_v11 = vld [vmem:[%s3698_s15 + $0x10] ss:$8 sps:$4 sm:$0xff]   ;;  %v2550_v12 = vld [vmem:[%s3698_s15 + $0x14] ss:$8 sps:$4 sm:$0xff]  }
 0xc06   : > { %2589 = vpow2.f32 %v1565_v13  ;;  %v2964_v13 = vmov 0  }
 0xc0e   : > { %v2588_v14 = vpop.eup %2587 }
 0xc0f   : > { %v1567_v15 = vsel %vm1426_vm5, %v2588_v14, 0.0 }
 0xc10   : > { %v2590_v17 = vpop.eup %2589  ;;  %1568 = vadd.xlane.f32.xlu1 %v1567_v15 }
 0xc11   : > { %v1570_v18 = vsel %vm1426_vm5, %v2590_v17, 0.0 }
 0xc12   : > { %1571 = vadd.xlane.f32.xlu0 %v1570_v18 }
 0xc21   : > { %1451 = vrot.lane.b32.xlu1 %v3511_v33, %s2959_s3  ;;  %s3760_s3 = sld [smem:[#allocation34_spill]] }
 0xc28   : > { %1578 = vrot.lane.b32.xlu0 %v3511_v33, %s2958_s14  ;;  %s3763_s14 = sld [smem:[#allocation37_spill]] }
 0xc2a   : > { %v1441_v20 = vpop.xlane.xlu1 %1440 }
 0xc2c   : > { %v1444_v19 = vpop.xlane.xlu0 %1443 }
 0xc2d   : > { %2591 = vrcp.f32 %v1444_v19 }
 0xc2e   : > { %2593 = vrcp.f32 %v1441_v20 }
 0xc37   : > { %v2592_v21 = vpop.eup %2591 }
 0xc38   : > { %v2594_v23 = vpop.eup %2593  ;;  %v1448_v25 = vmul.f32 %v2592_v21, %v2586_v6 }
 0xc39   : > { %v1447_v27 = vmul.f32 %v2594_v23, %v2584_v2  ;;  %v2209_v23 = vld [vmem:[%s3759_s22] ss:$0 sm:$0xff]  ;;  %s2865_s22 = sshll.u32 %s2965_s28, 4  ;;  %s2866_s22 = int_to_ptr.vmem [resolvable:$false] %s2865_s22 }
 0xc3a   : > { %s2867_s25 = scalar_lea.vmem %s2866_s22, 256  ;;  %p2868_p0 = scmp.lt.s32.totalorder %s3637_s4, %s2866_s22 }
 0xc3b   : > { %v1449_v30 = vpack.c.bf16 %v1448_v25, %v1447_v27  ;;  %v2210_v27 = vld [vmem:[%s3760_s3] ss:$0 sm:$0xff]  ;;  %s2235_s3 = sshll.u32 %s3088_s2, 7  ;;  %s1978_s2 = scalar_lea.sflag [#allocation5], %s3366_s7 }
 0xc3c   : > { %s3635_s6 = scalar_lea.hbm %s3764_s26, %s2235_s3 }
 0xc9d   : > { %v1569_v22 = vpop.xlane.xlu1 %1568 }
 0xc9e   : > { %2595 = vrcp.f32 %v1569_v22 }
 0xc9f   : > { %v1572_v24 = vpop.xlane.xlu0 %1571 }
 0xca0   : > { %2597 = vrcp.f32 %v1572_v24 }
 0xca1   : > { %v1452_v26 = vpop.permute.xlu1 %1451 }
 0xca2   : > { %v1458_v28 = vsel %vm1456_vm6, %v1452_v26, 0 }
 0xca3   : > { %2349 = vmatpush3.bf16.msra.mxu0 %v1458_v28  ;;  %v1579_v29 = vpop.permute.xlu0 %1578 }
 0xca4   : > { %2360 = vmatprep.subr.bf16.mxu0 %v2956_v16  ;;  %v1584_v31 = vsel %vm1456_vm6, %v1579_v29, 0 }
 0xca6   : > { %2351 = vmatmul.mubr.msk.bf16.vlgmr.msra.gmra.mrb[24].mxu0 %vm1426_vm5, %v1449_v30 }
 0xca7   : > { %2361 = vmatpush3.bf16.msra.mxu0 %v1584_v31  ;;  %2362 = vmatprep.mubr.msk.bf16.mxu0 %vm2957_vm1, %v2956_v16 }
 0xca8   : > { %v2596_v32 = vpop.eup %2595  ;;  %1788 = vmatprep.subr.bf16.mxu0 %v2547_v9 }
 0xca9   : > { %v1575_v34 = vmul.f32 %v2596_v32, %v2588_v14 }
 0xcaa   : > { %v2598_v33 = vpop.eup %2597 }
 0xcab   : > { %v1576_v35 = vmul.f32 %v2598_v33, %v2590_v17 }
 0xcad   : > { %v1577_v36 = vpack.c.bf16 %v1576_v35, %v1575_v34 }
 0xcaf   : > { %2363 = vmatmul.mubr.msk.bf16.vlgmr.msra.gmra.mrb[28].mxu0 %vm1426_vm5, %v1577_v36 }
 0xcb0   : > { %1789 = vmatpush1.bf16.msra.mxu0 %v2545_v10  ;;  %1820 = vmatprep.mubr.bf16.mxu0 %v2964_v13  ;;  %v2216_v13 = vld [vmem:[%s3763_s14] ss:$0 sm:$0xff] }
 0xcb1   : > { %1790 = vmatprep.subr.bf16.mxu0 %v2550_v12 }
 0xcb4   : > { %1791 = vmatpush1.bf16.msra.mxu0 %v2548_v11 }
 0xd79   : > { %v1494_v37 = vpop.f32.mrb[24].mxu0 }
 0xd7a   : > { %1501 = vst.msk [vmem:[#allocation2] sm:$0xff] %vm869_vm2, %v1494_v37  ;;  %v2352_v38 = vpop.f32.mrb[25].mxu0 }
 0xd7b   : > { %v1497_v40 = vpop.f32.mrb[26].mxu0 }
 0xd7c   : > { %1502 = vst.msk [vmem:[#allocation2 + $0x8] sm:$0xff] %vm869_vm2, %v1497_v40  ;;  %v2353_v41 = vpop.f32.mrb[27].mxu0  ;;  %v1755_v40 = vlaneseq }
 0xd7e   : > { %v1756_v41 = vshrl.u32 %v1755_v40, 7 }
 0xd80   : > { %v1761_v42 = vsub.s32 1, %v1756_v41 }
 0xd82   : > { %v1620_v43 = vpop.f32.mrb[28].mxu0 }
 0xd83   : > { %1629 = vrot.lane.b32.xlu1 %v1620_v43, %s2963_s29  ;;  %v2364_v44 = vpop.f32.mrb[29].mxu0  ;;  %v1753_v43 = vld [vmem:[%s3762_s23] sm:$0x3]  ;;  %s2861_s23 = scalar_lea.vmem %s3637_s4, 128 }
 0xd84   : > { %v1623_v45 = vpop.f32.mrb[30].mxu0  ;;  %v1762_v44 = vrot.slane %v1753_v43, %v1761_v42  ;;  %p2862_p13 = scmp.ne.s32.totalorder %s3637_s4, %s2861_s23  ;;  %p2869_p10 = scmp.lt.s32.totalorder %s2867_s25, %s2861_s23 }
 0xd85   : > { %v2365_v46 = vpop.f32.mrb[31].mxu0 }
 0xd86   : > { %p2863_p3 = pnand %p2862_p13, %p3765_p1  ;;  %p2870_p11 = por %p2869_p10, %p2868_p0 }
 0xd87   : > { %1631 = vrot.lane.b32.xlu1 %v1623_v45, %s2963_s29  ;;  %s3761_s29 = sld [smem:[#allocation36_spill]] }
 0xd88   : > { %p2864_p2 = pneg %p2863_p3 }
 0xd8a   : > { %p2871_p12 = pnand %p2870_p11, %p2864_p2 }
 0xd8d   : > { %v2551_v32 = vld [vmem:[%s3761_s29] sm:$0xff]   ;;  %v2552_v33 = vld [vmem:[%s3761_s29 + $0x8] sm:$0xff]   ;;  %v2553_v34 = vld [vmem:[%s3761_s29 + $0x10] sm:$0xff]  }
 0xd8e   : > { %v2554_v35 = vld [vmem:[%s3761_s29 + $0x18] sm:$0xff]   ;;  %v2555_v36 = vld [vmem:[%s3761_s29 + $0x20] sm:$0xff]   ;;  %v2556_v37 = vld [vmem:[%s3761_s29 + $0x28] sm:$0xff]  }
 0xd8f   : > { %v2557_v38 = vld [vmem:[%s3761_s29 + $0x30] sm:$0xff]   ;;  %v2558_v39 = vld [vmem:[%s3761_s29 + $0x38] sm:$0xff]  }
 0xdf5   : > { %v1630_v47 = vpop.permute.xlu1 %1629 }
 0xdf6   : > { %1635 = vst.msk [vmem:[#allocation2] sm:$0xff] %vm1119_vm3, %v1630_v47 }
 0xdf9   : > { %v1632_v48 = vpop.permute.xlu1 %1631 }
 0xdfa   : > { %1636 = vst.msk [vmem:[#allocation2 + $0x8] sm:$0xff] %vm1119_vm3, %v1632_v48 }
 0xdfd   : > { %v1637_v49 = vld [vmem:[#allocation2] sm:$0xff] }
 0xe01   : > { %v1638_v50 = vld [vmem:[#allocation2 + $0x8] sm:$0xff] }
 0xe02   : > { %v1639_v51 = vpack.c.bf16 %v1638_v50, %v1637_v49 }
 0xe04   : > { %2371 = vmatmul.mubr.msk.bf16.vlgmr.msra.gmra.mrb[16].mxu1 %vm752_vm0, %v1639_v51 }
 0xe05   : > { %2390 = vmatprep.mubr.msk.bf16.mxu1 %vm2957_vm1, %v2956_v16  ;;  %2375 = vmatpush3.bf16.msra.mxu1 %v2551_v32 }
 0xe06   : > { %2376 = vmatprep.subr.bf16.mxu1 %v2956_v16 }
 0xe09   : > { %2377 = vmatpush3.bf16.msra.mxu1 %v2552_v33 }
 0xe0a   : > { %2378 = vmatprep.subr.bf16.mxu1 %v2956_v16 }
 0xe0d   : > { %2379 = vmatpush3.bf16.msra.mxu1 %v2553_v34 }
 0xe0e   : > { %2380 = vmatprep.subr.bf16.mxu1 %v2956_v16 }
 0xe11   : > { %2381 = vmatpush3.bf16.msra.mxu1 %v2554_v35 }
 0xe12   : > { %2382 = vmatprep.subr.bf16.mxu1 %v2956_v16 }
 0xe15   : > { %2383 = vmatpush3.bf16.msra.mxu1 %v2555_v36 }
 0xe16   : > { %2384 = vmatprep.subr.bf16.mxu1 %v2956_v16 }
 0xe19   : > { %2385 = vmatpush3.bf16.msra.mxu1 %v2556_v37 }
 0xe1a   : > { %2386 = vmatprep.subr.bf16.mxu1 %v2956_v16 }
 0xe1d   : > { %2387 = vmatpush3.bf16.msra.mxu1 %v2557_v38 }
 0xe1e   : > { %2388 = vmatprep.subr.bf16.mxu1 %v2956_v16 }
 0xe21   : > { %2389 = vmatpush3.bf16.msra.mxu1 %v2558_v39 }
 0xed7   : > { %v1695_v53 = vpop.f32.mrb[16].mxu1 }
 0xed8   : > { %v1696_v54 = vadd.f32 %v2205_v52, %v1695_v53  ;;  %v2372_v56 = vpop.f32.mrb[17].mxu1 }
 0xed9   : > { %v1698_v57 = vpop.f32.mrb[18].mxu1 }
 0xeda   : > { %v3559_v59 = vadd.f32 %v1696_v54, %v3468_v55  ;;  %v1699_v60 = vadd.f32 %v2205_v52, %v1698_v57  ;;  %v2373_v61 = vpop.f32.mrb[19].mxu1 }
 0xedc   : > { %v3562_v62 = vadd.f32 %v1699_v60, %v3471_v58  ;;  %v1706_v63 = vsel %vm752_vm0, %v3559_v59, 0.0 }
 0xedd   : > { %1707 = vadd.xlane.f32.xlu1 %v1706_v63 }
 0xede   : > { %v1709_v0 = vsel %vm752_vm0, %v3562_v62, 0.0 }
 0xedf   : > { %1710 = vadd.xlane.f32.xlu0 %v1709_v0  ;;  %v1757_v0 = vsub.s32 0, %v1756_v41 }
 0xf6a   : > { %v1708_v1 = vpop.xlane.xlu1 %1707 }
 0xf6b   : > { %v1712_v3 = vmul.f32 0.03125, %v1708_v1  ;;  %v1758_v1 = vrot.slane %v1753_v43, %v1757_v0 }
 0xf6c   : > { %v1711_v4 = vpop.xlane.xlu0 %1710 }
 0xf6d   : > { %v1714_v2 = vsub.f32 %v3559_v59, %v1712_v3  ;;  %v1713_v55 = vmul.f32 0.03125, %v1711_v4 }
 0xf6f   : > { %v1715_v5 = vsub.f32 %v3562_v62, %v1713_v55  ;;  %v1716_v6 = vmul.f32 %v1714_v2, %v1714_v2 }
 0xf71   : > { %v1718_v58 = vsel %vm752_vm0, %v1716_v6, 0.0  ;;  %v1717_v7 = vmul.f32 %v1715_v5, %v1715_v5 }
 0xf72   : > { %1719 = vadd.xlane.f32.xlu0 %v1718_v58 }
 0xf73   : > { %v1721_v8 = vsel %vm752_vm0, %v1717_v7, 0.0 }
 0xf76   : > { %1722 = vadd.xlane.f32.xlu0 %v1721_v8 }
 0xfff   : > { %v1720_v14 = vpop.xlane.xlu0 %1719 }
0x1000   : > { %v1724_v15 = vmul.f32 0.03125, %v1720_v14 }
0x1002   : > { %v1726_v17 = vadd.f32 1e-05, %v1724_v15 }
0x1003   : > { %v1723_v18 = vpop.xlane.xlu0 %1722 }
0x1004   : > { %2599 = vrsqrt.f32 %v1726_v17  ;;  %v1725_v19 = vmul.f32 0.03125, %v1723_v18 }
0x1006   : > { %v1727_v20 = vadd.f32 1e-05, %v1725_v19 }
0x1008   : > { %2601 = vrsqrt.f32 %v1727_v20 }
0x100e   : > { %v2600_v21 = vpop.eup %2599 }
0x100f   : > { %v1730_v22 = vmul.f32 %v2600_v21, %v1714_v2 }
0x1011   : > { %v1738_v25 = vmul.f32 %v2209_v23, %v1730_v22 }
0x1012   : > { %v2602_v24 = vpop.eup %2601 }
0x1013   : > { %v1731_v26 = vmul.f32 %v2602_v24, %v1715_v5  ;;  %v1746_v29 = vadd.f32 %v2210_v27, %v1738_v25 }
0x1015   : > { %v1739_v28 = vmul.f32 %v2209_v23, %v1731_v26 }
0x1017   : > { %v1747_v30 = vadd.f32 %v2210_v27, %v1739_v28 }
0x1019   : > { %v1752_v31 = vpack.c.bf16 %v1747_v30, %v1746_v29 }
0x101b   : > { %2215 = vmatmul.mubr.msk.bf16.vlgmr.msra.gmra.mrb[32].mxu0 %vm752_vm0, %v1752_v31 }
0x10ee   : > { %v1822_v45 = vpop.f32.mrb[32].mxu0 }
0x10ef   : > { %v1824_v46 = vpop.f32.mrb[33].mxu0  ;;  %v1823_v5 = vadd.f32 %v1822_v45, %v1758_v1 }
0x10f0   : > { %v1825_v47 = vadd.f32 %v1824_v46, %v1762_v44  ;;  %v1826_v48 = vpop.f32.mrb[34].mxu0 }
0x10f1   : > { %v1828_v49 = vpop.f32.mrb[35].mxu0  ;;  %v1827_v8 = vadd.f32 %v1826_v48, %v1758_v1 }
0x10f2   : > { %v1833_v50 = vmul.f32 0.044715, %v1825_v47  ;;  %v1829_v51 = vadd.f32 %v1828_v49, %v1762_v44  ;;  %v1831_v4 = vmul.f32 0.5, %v1825_v47 }
0x10f4   : > { %v1835_v52 = vmul.f32 %v1833_v50, %v1825_v47  ;;  %v1834_v53 = vmul.f32 0.044715, %v1829_v51  ;;  %v1832_v6 = vmul.f32 0.5, %v1829_v51 }
0x10f6   : > { %v1837_v54 = vmul.f32 %v1835_v52, %v1825_v47  ;;  %v1836_v16 = vmul.f32 %v1834_v53, %v1829_v51 }
0x10f8   : > { %v1839_v56 = vadd.f32 %v1837_v54, %v1825_v47  ;;  %v1838_v57 = vmul.f32 %v1836_v16, %v1829_v51 }
0x10fa   : > { %v1841_v60 = vmul.f32 0.7978846, %v1839_v56  ;;  %v1840_v61 = vadd.f32 %v1838_v57, %v1829_v51 }
0x10fc   : > { %2603 = vtanh.f32 %v1841_v60  ;;  %v1842_v63 = vmul.f32 0.7978846, %v1840_v61 }
0x10fe   : > { %2605 = vtanh.f32 %v1842_v63 }
0x1106   : > { %v2604_v3 = vpop.eup %2603 }
0x1107   : > { %v1845_v2 = vadd.f32 1.0, %v2604_v3 }
0x1108   : > { %v2606_v55 = vpop.eup %2605 }
0x1109   : > { %v1846_v58 = vadd.f32 1.0, %v2606_v55  ;;  %v1847_v7 = vmul.f32 %v1845_v2, %v1831_v4 }
0x110b   : > { %v1848_v9 = vmul.f32 %v1846_v58, %v1832_v6  ;;  %v1849_v10 = vmul.f32 %v1847_v7, %v1823_v5 }
0x110d   : > { %v1850_v11 = vmul.f32 %v1848_v9, %v1827_v8 }
0x110f   : > { %v1867_v12 = vpack.c.bf16 %v1850_v11, %v1849_v10 }
0x1111   : > { %2391 = vmatmul.mubr.bf16.vlgmr.msra.gmra.mrb[20].mxu1 %v1867_v12 }
0x11e4   : > { %v1957_v14 = vpop.f32.mrb[20].mxu1 }
0x11e5   : > { %v1958_v15 = vadd.f32 %v2216_v13, %v1957_v14  ;;  %v2392_v17 = vpop.f32.mrb[21].mxu1 }
0x11e6   : > { %v1960_v18 = vpop.f32.mrb[22].mxu1 }
0x11e7   : > { %v1964_v19 = vadd.f32 %v1958_v15, %v3559_v59  ;;  %v1961_v20 = vadd.f32 %v2216_v13, %v1960_v18  ;;  %v2393_v21 = vpop.f32.mrb[23].mxu1 }
0x11e9   : > { %v2233_v22 = vpack.c.bf16 %v1964_v19, %v1964_v19  ;;  %v1965_v23 = vadd.f32 %v1961_v20, %v3562_v62 }
0x11eb   : > { %1975 = vst.msk [vmem:[%s738_s16] sm:$0xf] %vm1974_vm7, %v2233_v22  ;;  %v2234_v24 = vpack.c.bf16 %v1965_v23, %v1965_v23 }
0x11ed   : > { %1976 = vst.msk [vmem:[%s738_s16 + $0x4] sm:$0xf] %vm1974_vm7, %v2234_v24 }
0x11ee   : > { %2874 = shalt.err (!%p2871_p12)
}
0x11ef   : > { %s2875_s14 = scalar_lea.hbm %s3635_s6, 128  ;;  %s2879_s17 = scalar_lea.hbm %s3764_s26, 256 }
0x11f0   : > { %p2876_p8 = scmp.ne.s32.totalorder %s3635_s6, %s2875_s14  ;;  %p2880_p6 = scmp.lt.u32.totalorder %s3635_s6, %s3764_s26 }
0x11f1   : > { %p2881_p9 = scmp.lt.u32.totalorder %s2879_s17, %s2875_s14  ;;  %p2883_p13 = scmp.lt.u32.totalorder %s2875_s14, %s3635_s6 }
0x11f2   : > { %p2877_p5 = pnand %p2876_p8, %p3765_p1 }
0x11f3   : > { %p2882_p4 = por %p2881_p9, %p2880_p6 }
0x11f4   : > { %p2878_p7 = pneg %p2877_p5 }
0x11f5   : > { %p2884_p3 = por %p2883_p13, %p2882_p4 }
0x11f7   : > { %p2885_p2 = pnand %p2884_p3, %p2878_p7 }
0x11f9   : > { %2888 = shalt.err (!%p2885_p2)
}
0x11fa   : > { %s2966_s23 = smov 4   ;;  %s3766_s22 = smov 64  }
0x11fb   : > { %2428 = dma.vmem_to_hbm [thread:$0]  (%p3765_p1), %s3637_s4, 128, %s3635_s6, %s1978_s2, %s3766_s22, %s3766_s22, %s2966_s23  }
0x11fc PF: > { %s2006_s25 = sand.u32 1, %s2931_s0   ;;  %p3767_p0 = scmp.ne.s32.totalorder %s3746_s13, 0 }
0x11fd   : > { %p3768_p10 = scmp.ge.s32.totalorder %s2943_s21, 2  ;;  %s2007_s14 = scalar_lea.sflag [#allocation5], %s2006_s25 }
0x11ff   : > { %p2460_p11 = pnand %p3768_p10, %p3767_p0 }
0x1201   : > { %2926 = dma.done.wait (!%p2460_p11), %s2007_s14, 128  }
0x1202   : > { %2928 = vsyncadd (!%p2460_p11), %s2007_s14, 4294967168  ;;  %p36_p12 = scmp.ge.s32.totalorder %s3290_s24, 4   ;;  %s3769_s0 = smov %s2935_s30 }
0x1203   : > { %s3770_s30 = smov %s2939_s20  ;;  %s3771_s20 = smov %s3301_s19 }
0x1204   : > { %s3772_s21 = smov %s3290_s24  ;;  %38 = sbr.rel (!%p36_p12) target bundleno = 24 (0x18), region = 176 }
0x120b   :  { %2012 = vsyncpa [#allocation4], 1 }
0x120c   :  { %2014 = vsyncpa [#allocation4 + $0x1], 1 }
0x120d   :  { %2015 = vsyncpa [#allocation7], 1 }
0x120e   :  { %2016 = vsyncpa [#allocation10], 1 }
0x120f   :  { %2017 = vsyncpa [#allocation13], 1 }
0x1210   :  { %2018 = vsyncpa [#allocation16], 1 }
0x1211   :  { %2019 = vsyncpa [#allocation5], 1 }
0x1212   :  { %2021 = vsyncpa [#allocation5 + $0x1], 1 }

</bundles_post_ra>
